<compile_context>
chip_gen: v5e
topology: v5e:2x2
jax: 0.10.0
libtpu: 0.0.40
codegen_flags: <defaults>
</compile_context>

<pallas_src>
import math

import jax
import jax.numpy as jnp
from jax import lax
from jax.experimental import pallas as pl
from jax.experimental.pallas import tpu as pltpu  # noqa: F401  (kept for TPU-specific tuning hooks)


def _ntm_seq_kernel(
    # inputs (whole arrays, VMEM-resident for the entire call)
    gx_ref,        # (T, B, 4H)     x @ W_x + b_lstm for every timestep
    rh0_ref,       # (B, NH*M + H)  initial [reads_flat, h]
    c0_ref,        # (B, H)         initial cell state
    w0_ref,        # (B, NH2, N)    initial head weights
    mem0_ref,      # (B, N, M)      initial memory
    w_rh_ref,      # (NH*M + H, 4H) fused recurrent LSTM weight
    w_heads_ref,   # (H, NH2*P)     all head linears fused
    b_heads_ref,   # (1, NH2*P)
    w_o_ref,       # (NH*M + H, O)  fused output weight over [reads, h]
    b_o_ref,       # (1, O)
    # outputs (the state outputs double as the VMEM-resident recurrent carries)
    out_ref,       # (T, B, O)      per-step outputs
    rh_ref,        # (B, NH*M + H)  final [reads_flat, h]
    c_ref,         # (B, H)         final cell state
    w_ref,         # (B, NH2, N)    final head weights
    mem_ref,       # (B, N, M)      final memory
):
    T = gx_ref.shape[0]
    B, H = c0_ref.shape
    _, N, M = mem0_ref.shape
    NH2 = w0_ref.shape[1]
    NH = NH2 // 2
    P = 3 * M + 6
    NHM = NH * M

    # ---- initialize the carries (output refs) from the initial state ----
    rh_ref[...] = rh0_ref[...]
    c_ref[...] = c0_ref[...]
    w_ref[...] = w0_ref[...]
    mem_ref[...] = mem0_ref[...]

    # weights: load once, close over the values inside the time loop
    w_rh = w_rh_ref[...]
    w_heads = w_heads_ref[...]
    b_heads = b_heads_ref[...]
    w_o = w_o_ref[...]
    b_o = b_o_ref[...]

    def step(t, carry):
        rh = rh_ref[...]            # previous [reads_flat, h]
        c = c_ref[...]              # previous cell state
        mem = mem_ref[...]          # previous memory

        # ---------- LSTMCell controller: one fused MXU push ----------
        gates = gx_ref[t] + jnp.dot(rh, w_rh, preferred_element_type=jnp.float32)
        i_g = jax.nn.sigmoid(gates[:, 0 * H:1 * H])
        f_g = jax.nn.sigmoid(gates[:, 1 * H:2 * H])
        g_g = jnp.tanh(gates[:, 2 * H:3 * H])
        o_g = jax.nn.sigmoid(gates[:, 3 * H:4 * H])
        c_new = f_g * c + i_g * g_g
        h_new = o_g * jnp.tanh(c_new)
        # NTM.forward hands the controller *cell* state to the heads (per the spec).
        ctrl = c_new

        # ---------- all head linears fused into one matmul ----------
        p_all = (jnp.dot(ctrl, w_heads, preferred_element_type=jnp.float32)
                 + b_heads).reshape(B, NH2, P)
        # packed columns: [key(M), beta(1), gate(1), shift(3), gamma(1), erase(M), add(M)]
        key_all = p_all[:, :, 0:M]                                  # (B, NH2, M)
        beta_all = jax.nn.softplus(p_all[:, :, M:M + 1])            # (B, NH2, 1)
        g_all = jax.nn.sigmoid(p_all[:, :, M + 1:M + 2])            # (B, NH2, 1)
        s_all = jax.nn.softmax(p_all[:, :, M + 2:M + 5], axis=-1)   # (B, NH2, 3)
        gamma_all = 1.0 + jax.nn.softplus(p_all[:, :, M + 5:M + 6])  # (B, NH2, 1)
        erase_all = jax.nn.sigmoid(p_all[:, :, M + 6:2 * M + 6])    # (B, NH2, M)
        add_all = p_all[:, :, 2 * M + 6:3 * M + 6]                  # (B, NH2, M)
        key_n_all = jnp.sqrt(jnp.sum(key_all * key_all, axis=-1, keepdims=True))

        # ---------- heads: one (read, write) pair per iteration ----------
        # Both heads of a pair address the SAME pre-write memory snapshot, so
        # their content addressing is batched into one einsum + one softmax.
        for hp in range(NH):
            lo, hi = 2 * hp, 2 * hp + 2
            keys = key_all[:, lo:hi, :]                             # (B, 2, M)
            mem_n = jnp.sqrt(jnp.sum(mem * mem, axis=-1))           # (B, N)
            dots = jnp.einsum('bhm,bnm->bhn', keys, mem,
                              preferred_element_type=jnp.float32)   # (B, 2, N)
            sim = dots / jnp.maximum(key_n_all[:, lo:hi, :] * mem_n[:, None, :], 1e-8)
            content_w = jax.nn.softmax(beta_all[:, lo:hi, :] * sim, axis=-1)

            # interpolation with the previous head weights
            gg = g_all[:, lo:hi, :]
            gated = gg * content_w + (1.0 - gg) * w_ref[:, lo:hi, :]

            # circular convolution with the 3-tap shift kernel (offsets -1, 0, +1)
            w_m1 = jnp.roll(gated, 1, axis=-1)     # w[i-1]
            w_p1 = jnp.roll(gated, -1, axis=-1)    # w[i+1]
            ss = s_all[:, lo:hi, :]
            shifted = ss[..., 0:1] * w_m1 + ss[..., 1:2] * gated + ss[..., 2:3] * w_p1

            # sharpening (exact normalization; approx recip would drift over T)
            wpow = jnp.exp(gamma_all[:, lo:hi, :]
                           * jnp.log(jnp.maximum(shifted, 1e-16)))
            w_pair = wpow / (jnp.sum(wpow, axis=-1, keepdims=True) + 1e-16)
            w_ref[:, lo:hi, :] = w_pair

            # read head: r = w_r @ memory (batched contraction)
            read = jnp.einsum('bhn,bnm->bhm', w_pair[:, 0:1, :], mem,
                              preferred_element_type=jnp.float32)[:, 0, :]
            rh_ref[:, hp * M:(hp + 1) * M] = read   # slice-store, no concat temp

            # write head: erase then add
            w_w = w_pair[:, 1, :]                   # (B, N)
            erase = erase_all[:, lo + 1, :]         # (B, M)
            add = add_all[:, lo + 1, :]             # (B, M)
            we = w_w[:, :, None]
            mem = mem * (1.0 - we * erase[:, None, :]) + we * add[:, None, :]

        # ---------- carry new state ----------
        mem_ref[...] = mem
        c_ref[...] = c_new
        rh_ref[:, NHM:] = h_new

        # ---------- controller.output(read_data): one fused matmul ----------
        out_ref[t] = jax.nn.sigmoid(
            jnp.dot(rh_ref[...], w_o, preferred_element_type=jnp.float32) + b_o)
        return carry

    lax.fori_loop(0, T, step, 0, unroll=(T <= 8))


def ntm_forward_seq(params, state, x_seq):
    """Run T NTM steps in ONE pallas_call (time loop inside the kernel).

    Returns (outputs (T, B, O), new_state)."""
    (w_x, w_r, w_hh, b_lstm, head_w, head_b, w_oh, w_or, b_out) = params
    (h, c, mem, prev_w, prev_reads) = state
    T, B, _ = x_seq.shape
    H = h.shape[1]
    N, M = mem.shape[1], mem.shape[2]
    NH2 = prev_w.shape[0]
    NH = NH2 // 2
    NHM = NH * M
    P = 3 * M + 6
    O = b_out.shape[1]

    # x-contribution of the LSTM gates for the whole sequence: one big XLA matmul.
    gx_seq = jnp.einsum('tbx,xg->tbg', x_seq, w_x) + b_lstm            # (T, B, 4H)
    # fused recurrent weight over [reads, h]
    w_rh = jnp.concatenate([w_r, w_hh], axis=0)                        # (NHM+H, 4H)
    # all head linears fused: (NH2, H, P) -> (H, NH2*P)
    w_heads = jnp.transpose(head_w, (1, 0, 2)).reshape(H, NH2 * P)
    b_heads = jnp.transpose(head_b, (1, 0, 2)).reshape(1, NH2 * P)
    # fused output weight over [reads, h]
    w_o = jnp.concatenate([w_or, w_oh], axis=0)                        # (NHM+H, O)
    # initial [reads_flat, h]
    rh0 = jnp.concatenate(
        [prev_reads.transpose(1, 0, 2).reshape(B, NHM), h], axis=-1)   # (B, NHM+H)
    # head weights carried as (B, NH2, N) so a pair is one contiguous slice
    w0 = prev_w.transpose(1, 0, 2)                                     # (B, NH2, N)

    out_shapes = (
        jax.ShapeDtypeStruct((T, B, O), jnp.float32),      # per-step outputs
        jax.ShapeDtypeStruct((B, NHM + H), jnp.float32),   # final [reads, h]
        jax.ShapeDtypeStruct((B, H), jnp.float32),         # final c
        jax.ShapeDtypeStruct((B, NH2, N), jnp.float32),    # final head weights
        jax.ShapeDtypeStruct((B, N, M), jnp.float32),      # final memory
    )
    # No grid: everything lives in VMEM for the whole call; the time loop runs
    # inside the kernel, state outputs double as the recurrent carries.
    out_seq, rh_fin, c_fin, w_fin, mem_fin = pl.pallas_call(
        _ntm_seq_kernel,
        out_shape=out_shapes,
    )(gx_seq, rh0, c, w0, mem, w_rh, w_heads, b_heads, w_o, b_out)

    new_reads = rh_fin[:, :NHM].reshape(B, NH, M).transpose(1, 0, 2)
    new_h = rh_fin[:, NHM:]
    new_w = w_fin.transpose(1, 0, 2)                                   # (NH2, B, N)
    new_state = (new_h, c_fin, mem_fin, new_w, new_reads)
    return out_seq, new_state


def ntm_forward(params, state, x):
    """Single NTM.forward step (matches the PyTorch module's forward)."""
    out_seq, new_state = ntm_forward_seq(params, state, x[None])
    return out_seq[0], new_state


def ntm_forward_ref(params, state, x):
    """Pure-JAX reference of one NTM step (for correctness checks)."""
    (w_x, w_r, w_hh, b_lstm, head_w, head_b, w_oh, w_or, b_out) = params
    (h, c, mem, prev_w, prev_reads) = state
    B = x.shape[0]
    H = h.shape[1]
    M = mem.shape[2]
    NH2 = prev_w.shape[0]
    reads_flat = prev_reads.transpose(1, 0, 2).reshape(B, -1)

    gates = x @ w_x + reads_flat @ w_r + h @ w_hh + b_lstm
    i_g = jax.nn.sigmoid(gates[:, 0 * H:1 * H])
    f_g = jax.nn.sigmoid(gates[:, 1 * H:2 * H])
    g_g = jnp.tanh(gates[:, 2 * H:3 * H])
    o_g = jax.nn.sigmoid(gates[:, 3 * H:4 * H])
    c_new = f_g * c + i_g * g_g
    h_new = o_g * jnp.tanh(c_new)
    ctrl = c_new

    reads, head_ws = [], []
    for hd in range(NH2):
        p = ctrl @ head_w[hd] + head_b[hd]
        key = p[:, 0:M]
        beta = jax.nn.softplus(p[:, M:M + 1])
        g = jax.nn.sigmoid(p[:, M + 1:M + 2])
        s = jax.nn.softmax(p[:, M + 2:M + 5], axis=-1)
        gamma = 1.0 + jax.nn.softplus(p[:, M + 5:M + 6])
        dots = jnp.sum(key[:, None, :] * mem, axis=-1)
        key_n = jnp.sqrt(jnp.sum(key * key, axis=-1, keepdims=True))
        mem_n = jnp.sqrt(jnp.sum(mem * mem, axis=-1))
        sim = dots / jnp.maximum(key_n * mem_n, 1e-8)
        content_w = jax.nn.softmax(beta * sim, axis=-1)
        gated = g * content_w + (1.0 - g) * prev_w[hd]
        w_m1 = jnp.roll(gated, 1, axis=1)
        w_p1 = jnp.roll(gated, -1, axis=1)
        shifted = s[:, 0:1] * w_m1 + s[:, 1:2] * gated + s[:, 2:3] * w_p1
        wpow = jnp.exp(gamma * jnp.log(jnp.maximum(shifted, 1e-16)))
        w = wpow / (jnp.sum(wpow, axis=-1, keepdims=True) + 1e-16)
        head_ws.append(w)
        if hd % 2 == 0:
            reads.append(jnp.sum(w[:, :, None] * mem, axis=1))
        else:
            erase = jax.nn.sigmoid(p[:, M + 6:2 * M + 6])
            add = p[:, 2 * M + 6:3 * M + 6]
            mem = mem * (1.0 - w[:, :, None] * erase[:, None, :]) \
                + w[:, :, None] * add[:, None, :]
    r_cat = jnp.concatenate(reads, axis=-1)
    out = jax.nn.sigmoid(h_new @ w_oh + r_cat @ w_or + b_out)
    new_state = (h_new, c_new, mem, jnp.stack(head_ws), jnp.stack(reads))
    return out, new_state


def init_ntm(key, input_size, output_size, controller_size,
             memory_units, memory_unit_size, num_heads, batch_size):
    """Deterministic, PyTorch-default-style initialization of all params & state."""
    H, N, M = controller_size, memory_units, memory_unit_size
    NH, NH2 = num_heads, 2 * num_heads
    lstm_in = input_size + NH * M
    P = 3 * M + 6

    def uniform(k, shape, bound):
        return jax.random.uniform(k, shape, jnp.float32, -bound, bound)

    keys = jax.random.split(key, 16)

    # LSTMCell parameters (PyTorch layout (4H, in)), stored transposed for the kernel.
    kb = 1.0 / math.sqrt(H)
    w_ih = uniform(keys[0], (4 * H, lstm_in), kb)
    w_hh = uniform(keys[1], (4 * H, H), kb)
    b_ih = uniform(keys[2], (4 * H,), kb)
    b_hh = uniform(keys[3], (4 * H,), kb)
    w_x = jnp.transpose(w_ih[:, :input_size])      # (X, 4H)
    w_r = jnp.transpose(w_ih[:, input_size:])      # (NH*M, 4H)
    w_hh_t = jnp.transpose(w_hh)                   # (H, 4H)
    b_lstm = (b_ih + b_hh)[None, :]                # (1, 4H)

    # Per-head linears, packed: [key(M), beta(1), gate(1), shift(3), gamma(1), erase(M), add(M)]
    kh = 1.0 / math.sqrt(H)
    hkeys = jax.random.split(keys[4], NH2)
    head_w_l, head_b_l = [], []
    for i in range(NH2):
        kw, kbias = jax.random.split(hkeys[i])
        head_w_l.append(jnp.transpose(uniform(kw, (P, H), kh)))   # (H, P)
        head_b_l.append(uniform(kbias, (P,), kh)[None, :])        # (1, P)
    head_w = jnp.stack(head_w_l)                                  # (NH2, H, P)
    head_b = jnp.stack(head_b_l)                                  # (NH2, 1, P)

    # Output linear over concat(h, reads).
    read_size = H + NH * M
    ko = 1.0 / math.sqrt(read_size)
    w_out = uniform(keys[5], (output_size, read_size), ko)
    b_out = uniform(keys[6], (output_size,), ko)[None, :]
    w_oh = jnp.transpose(w_out[:, :H])             # (H, O)
    w_or = jnp.transpose(w_out[:, H:])             # (NH*M, O)

    params = (w_x, w_r, w_hh_t, b_lstm, head_w, head_b, w_oh, w_or, b_out)

    # State, per NTM.reset(): zero h/c/head-weights, kaiming-uniform memory & prev_reads.
    h0 = jnp.zeros((batch_size, H), jnp.float32)
    c0 = jnp.zeros((batch_size, H), jnp.float32)
    km = math.sqrt(6.0 / M)
    mem0 = uniform(keys[7], (batch_size, N, M), km)
    prev_w0 = jnp.zeros((NH2, batch_size, N), jnp.float32)
    prev_reads0 = uniform(keys[8], (NH, batch_size, M), km)
    state = (h0, c0, mem0, prev_w0, prev_reads0)
    return params, state


if __name__ == "__main__":
    # Small config: NTM(input_size=8, output_size=8, controller_size=32,
    #                  memory_units=16, memory_unit_size=8, num_heads=1), batch=2.
    INPUT_SIZE, OUTPUT_SIZE, CTRL, N_MEM, M_MEM, N_HEADS, BATCH = 8, 8, 32, 16, 8, 1, 2
    SEQ_LEN = 6

    key = jax.random.PRNGKey(0)
    k_param, k_x = jax.random.split(key)
    params, state = init_ntm(k_param, INPUT_SIZE, OUTPUT_SIZE, CTRL,
                             N_MEM, M_MEM, N_HEADS, BATCH)
    x_seq = jax.random.normal(k_x, (SEQ_LEN, BATCH, INPUT_SIZE), jnp.float32)

    # --- single NTM.forward step (matches the PyTorch module) ---
    out1, st1 = jax.jit(ntm_forward)(params, state, x_seq[0])
    jax.block_until_ready(out1)
    out1_ref, st1_ref = ntm_forward_ref(params, state, x_seq[0])
    assert out1.shape == (BATCH, OUTPUT_SIZE)
    assert bool(jnp.all(jnp.isfinite(out1)))
    assert bool(jnp.allclose(out1, out1_ref, rtol=1e-2, atol=1e-2)), "step output mismatch"
    assert bool(jnp.allclose(st1[2], st1_ref[2], rtol=1e-2, atol=1e-2)), "memory mismatch"
    assert bool(jnp.allclose(st1[3], st1_ref[3], rtol=1e-2, atol=1e-2)), "head-weight mismatch"

    # --- whole sequence in ONE kernel launch (time loop inside the kernel) ---
    out_seq, fin_state = jax.jit(ntm_forward_seq)(params, state, x_seq)
    jax.block_until_ready(out_seq)
    jax.block_until_ready(fin_state)

    st = state
    ref_outs = []
    for t in range(SEQ_LEN):
        o, st = ntm_forward_ref(params, st, x_seq[t])
        ref_outs.append(o)
    ref_outs = jnp.stack(ref_outs)
    assert out_seq.shape == (SEQ_LEN, BATCH, OUTPUT_SIZE)
    assert bool(jnp.all(jnp.isfinite(out_seq)))
    assert bool(jnp.allclose(out_seq, ref_outs, rtol=2e-2, atol=2e-2)), "sequence mismatch"
    assert bool(jnp.allclose(fin_state[2], st[2], rtol=2e-2, atol=2e-2)), "final memory mismatch"

    # TODO(synk): the `save_weigths` bookkeeping (host-side Python list appends /
    # .tolist()) has no kernel equivalent; the final head weights are returned in
    # `new_state` instead of being accumulated per step.
    print("KERNEL_OK")
</pallas_src>

<mosaic_0001>
module attributes {stable_mosaic.version = 11 : i64} {
  func.func @_ntm_seq_kernel(%arg0: memref<1x2x128xf32, #tpu.memory_space<vmem>>, %arg1: memref<2x40xf32, #tpu.memory_space<vmem>>, %arg2: memref<2x32xf32, #tpu.memory_space<vmem>>, %arg3: memref<2x2x16xf32, #tpu.memory_space<vmem>>, %arg4: memref<2x16x8xf32, #tpu.memory_space<vmem>>, %arg5: memref<40x128xf32, #tpu.memory_space<vmem>>, %arg6: memref<32x60xf32, #tpu.memory_space<vmem>>, %arg7: memref<1x60xf32, #tpu.memory_space<vmem>>, %arg8: memref<40x8xf32, #tpu.memory_space<vmem>>, %arg9: memref<1x8xf32, #tpu.memory_space<vmem>>, %arg10: memref<1x2x8xf32, #tpu.memory_space<vmem>>, %arg11: memref<2x40xf32, #tpu.memory_space<vmem>>, %arg12: memref<2x32xf32, #tpu.memory_space<vmem>>, %arg13: memref<2x2x16xf32, #tpu.memory_space<vmem>>, %arg14: memref<2x16x8xf32, #tpu.memory_space<vmem>>) attributes {dimension_semantics = [], scalar_prefetch = 0 : i64, scratch_operands = 0 : i64, tpu.core_type = #tpu.core_type<tc>} {
    %c0 = arith.constant 0 : index
    %c0_0 = arith.constant 0 : index
    %0 = vector.load %arg1[%c0, %c0_0] : memref<2x40xf32, #tpu.memory_space<vmem>>, vector<2x40xf32>
    %c0_1 = arith.constant 0 : index
    %c0_2 = arith.constant 0 : index
    %1 = vector.load %arg11[%c0_1, %c0_2] : memref<2x40xf32, #tpu.memory_space<vmem>>, vector<2x40xf32>
    tpu.vector_store %arg11[%c0_1, %c0_2], %0 {strides = array<i32>} : memref<2x40xf32, #tpu.memory_space<vmem>>, vector<2x40xf32>,
    %c0_3 = arith.constant 0 : index
    %c0_4 = arith.constant 0 : index
    %2 = vector.load %arg2[%c0_3, %c0_4] : memref<2x32xf32, #tpu.memory_space<vmem>>, vector<2x32xf32>
    %c0_5 = arith.constant 0 : index
    %c0_6 = arith.constant 0 : index
    %3 = vector.load %arg12[%c0_5, %c0_6] : memref<2x32xf32, #tpu.memory_space<vmem>>, vector<2x32xf32>
    tpu.vector_store %arg12[%c0_5, %c0_6], %2 {strides = array<i32>} : memref<2x32xf32, #tpu.memory_space<vmem>>, vector<2x32xf32>,
    %c0_7 = arith.constant 0 : index
    %c0_8 = arith.constant 0 : index
    %c0_9 = arith.constant 0 : index
    %4 = vector.load %arg3[%c0_7, %c0_8, %c0_9] : memref<2x2x16xf32, #tpu.memory_space<vmem>>, vector<2x2x16xf32>
    %c0_10 = arith.constant 0 : index
    %c0_11 = arith.constant 0 : index
    %c0_12 = arith.constant 0 : index
    %5 = vector.load %arg13[%c0_10, %c0_11, %c0_12] : memref<2x2x16xf32, #tpu.memory_space<vmem>>, vector<2x2x16xf32>
    tpu.vector_store %arg13[%c0_10, %c0_11, %c0_12], %4 {strides = array<i32>} : memref<2x2x16xf32, #tpu.memory_space<vmem>>, vector<2x2x16xf32>,
    %c0_13 = arith.constant 0 : index
    %c0_14 = arith.constant 0 : index
    %c0_15 = arith.constant 0 : index
    %6 = vector.load %arg4[%c0_13, %c0_14, %c0_15] : memref<2x16x8xf32, #tpu.memory_space<vmem>>, vector<2x16x8xf32>
    %c0_16 = arith.constant 0 : index
    %c0_17 = arith.constant 0 : index
    %c0_18 = arith.constant 0 : index
    %7 = vector.load %arg14[%c0_16, %c0_17, %c0_18] : memref<2x16x8xf32, #tpu.memory_space<vmem>>, vector<2x16x8xf32>
    tpu.vector_store %arg14[%c0_16, %c0_17, %c0_18], %6 {strides = array<i32>} : memref<2x16x8xf32, #tpu.memory_space<vmem>>, vector<2x16x8xf32>,
    %c0_19 = arith.constant 0 : index
    %c0_20 = arith.constant 0 : index
    %8 = vector.load %arg5[%c0_19, %c0_20] : memref<40x128xf32, #tpu.memory_space<vmem>>, vector<40x128xf32>
    %c0_21 = arith.constant 0 : index
    %c0_22 = arith.constant 0 : index
    %9 = vector.load %arg6[%c0_21, %c0_22] : memref<32x60xf32, #tpu.memory_space<vmem>>, vector<32x60xf32>
    %c0_23 = arith.constant 0 : index
    %c0_24 = arith.constant 0 : index
    %10 = vector.load %arg7[%c0_23, %c0_24] : memref<1x60xf32, #tpu.memory_space<vmem>>, vector<1x60xf32>
    %c0_25 = arith.constant 0 : index
    %c0_26 = arith.constant 0 : index
    %11 = vector.load %arg8[%c0_25, %c0_26] : memref<40x8xf32, #tpu.memory_space<vmem>>, vector<40x8xf32>
    %c0_27 = arith.constant 0 : index
    %c0_28 = arith.constant 0 : index
    %12 = vector.load %arg9[%c0_27, %c0_28] : memref<1x8xf32, #tpu.memory_space<vmem>>, vector<1x8xf32>
    %c0_i32 = arith.constant 0 : i32
    %c0_29 = arith.constant 0 : index
    %c0_30 = arith.constant 0 : index
    %13 = vector.load %arg11[%c0_29, %c0_30] : memref<2x40xf32, #tpu.memory_space<vmem>>, vector<2x40xf32>
    %c0_31 = arith.constant 0 : index
    %c0_32 = arith.constant 0 : index
    %14 = vector.load %arg12[%c0_31, %c0_32] : memref<2x32xf32, #tpu.memory_space<vmem>>, vector<2x32xf32>
    %c0_33 = arith.constant 0 : index
    %c0_34 = arith.constant 0 : index
    %c0_35 = arith.constant 0 : index
    %15 = vector.load %arg14[%c0_33, %c0_34, %c0_35] : memref<2x16x8xf32, #tpu.memory_space<vmem>>, vector<2x16x8xf32>
    %16 = arith.index_cast %c0_i32 : i32 to index
    %c0_36 = arith.constant 0 : index
    %c0_37 = arith.constant 0 : index
    %17 = vector.load %arg0[%16, %c0_36, %c0_37] : memref<1x2x128xf32, #tpu.memory_space<vmem>>, vector<1x2x128xf32>
    %18 = vector.shape_cast %17 : vector<1x2x128xf32> to vector<2x128xf32>
    %cst = arith.constant dense<0.000000e+00> : vector<2x128xf32>
    %19 = tpu.matmul %13, %8, %cst {dimension_numbers = #tpu.dot_dimension_numbers<[1], [0], [0], [1], [0, 0, 1, 1], [], []>} : vector<2x40xf32>, vector<40x128xf32>, vector<2x128xf32> -> vector<2x128xf32>
    %20 = arith.addf %18, %19 : vector<2x128xf32>
    %21 = vector.extract_strided_slice %20 {offsets = [0, 0], sizes = [2, 32], strides = [1, 1]} : vector<2x128xf32> to vector<2x32xf32>
    %22 = arith.negf %21 : vector<2x32xf32>
    %23 = math.exp %22 : vector<2x32xf32>
    %cst_38 = arith.constant 1.000000e+00 : f32
    %24 = vector.broadcast %cst_38 : f32 to vector<2x32xf32>
    %25 = arith.addf %24, %23 : vector<2x32xf32>
    %26 = arith.divf %24, %25 : vector<2x32xf32>
    %27 = vector.extract_strided_slice %20 {offsets = [0, 32], sizes = [2, 32], strides = [1, 1]} : vector<2x128xf32> to vector<2x32xf32>
    %28 = arith.negf %27 : vector<2x32xf32>
    %29 = math.exp %28 : vector<2x32xf32>
    %cst_39 = arith.constant 1.000000e+00 : f32
    %30 = vector.broadcast %cst_39 : f32 to vector<2x32xf32>
    %31 = arith.addf %30, %29 : vector<2x32xf32>
    %32 = arith.divf %30, %31 : vector<2x32xf32>
    %33 = vector.extract_strided_slice %20 {offsets = [0, 64], sizes = [2, 32], strides = [1, 1]} : vector<2x128xf32> to vector<2x32xf32>
    %34 = math.tanh %33 : vector<2x32xf32>
    %35 = vector.extract_strided_slice %20 {offsets = [0, 96], sizes = [2, 32], strides = [1, 1]} : vector<2x128xf32> to vector<2x32xf32>
    %36 = arith.negf %35 : vector<2x32xf32>
    %37 = math.exp %36 : vector<2x32xf32>
    %cst_40 = arith.constant 1.000000e+00 : f32
    %38 = vector.broadcast %cst_40 : f32 to vector<2x32xf32>
    %39 = arith.addf %38, %37 : vector<2x32xf32>
    %40 = arith.divf %38, %39 : vector<2x32xf32>
    %41 = arith.mulf %32, %14 : vector<2x32xf32>
    %42 = arith.mulf %26, %34 : vector<2x32xf32>
    %43 = arith.addf %41, %42 : vector<2x32xf32>
    %44 = math.tanh %43 : vector<2x32xf32>
    %45 = arith.mulf %40, %44 : vector<2x32xf32>
    %cst_41 = arith.constant dense<0.000000e+00> : vector<2x60xf32>
    %46 = tpu.matmul %43, %9, %cst_41 {dimension_numbers = #tpu.dot_dimension_numbers<[1], [0], [0], [1], [0, 0, 1, 1], [], []>} : vector<2x32xf32>, vector<32x60xf32>, vector<2x60xf32> -> vector<2x60xf32>
    %47 = vector.broadcast %10 : vector<1x60xf32> to vector<2x60xf32>
    %48 = arith.addf %46, %47 : vector<2x60xf32>
    %49 = vector.shape_cast %48 : vector<2x60xf32> to vector<2x2x30xf32>
    %50 = vector.extract_strided_slice %49 {offsets = [0, 0, 0], sizes = [2, 2, 8], strides = [1, 1, 1]} : vector<2x2x30xf32> to vector<2x2x8xf32>
    %51 = vector.extract_strided_slice %49 {offsets = [0, 0, 8], sizes = [2, 2, 1], strides = [1, 1, 1]} : vector<2x2x30xf32> to vector<2x2x1xf32>
    %cst_42 = arith.constant 0.000000e+00 : f32
    %52 = vector.broadcast %cst_42 : f32 to vector<2x2x1xf32>
    %53 = arith.maximumf %51, %52 : vector<2x2x1xf32>
    %54 = vector.broadcast %cst_42 : f32 to vector<2x2x1xf32>
    %55 = arith.subf %51, %54 : vector<2x2x1xf32>
    %56 = arith.cmpf one, %55, %55 : vector<2x2x1xf32>
    %57 = vector.broadcast %cst_42 : f32 to vector<2x2x1xf32>
    %58 = arith.addf %51, %57 : vector<2x2x1xf32>
    %59 = math.absf %55 : vector<2x2x1xf32>
    %cst_43 = arith.constant 0.000000e+00 : f32
    %60 = vector.broadcast %cst_43 : f32 to vector<2x2x1xf32>
    %61 = arith.subf %60, %59 : vector<2x2x1xf32>
    %62 = math.exp %61 : vector<2x2x1xf32>
    %63 = math.log1p %62 : vector<2x2x1xf32>
    %64 = arith.addf %53, %63 : vector<2x2x1xf32>
    %65 = arith.select %56, %58, %64 : vector<2x2x1xi1>, vector<2x2x1xf32>
    %66 = vector.extract_strided_slice %49 {offsets = [0, 0, 9], sizes = [2, 2, 1], strides = [1, 1, 1]} : vector<2x2x30xf32> to vector<2x2x1xf32>
    %67 = arith.negf %66 : vector<2x2x1xf32>
    %68 = math.exp %67 : vector<2x2x1xf32>
    %cst_44 = arith.constant 1.000000e+00 : f32
    %69 = vector.broadcast %cst_44 : f32 to vector<2x2x1xf32>
    %70 = arith.addf %69, %68 : vector<2x2x1xf32>
    %71 = arith.divf %69, %70 : vector<2x2x1xf32>
    %72 = vector.extract_strided_slice %49 {offsets = [0, 0, 10], sizes = [2, 2, 3], strides = [1, 1, 1]} : vector<2x2x30xf32> to vector<2x2x3xf32>
    %cst_45 = arith.constant dense<0xFF800000> : vector<2x2xf32>
    %73 = vector.multi_reduction <maximumf>, %72, %cst_45 [2] : vector<2x2x3xf32> to vector<2x2xf32>
    %cst_46 = arith.constant 0xFF800000 : f32
    %74 = vector.broadcast %cst_46 : f32 to vector<2x2xf32>
    %75 = arith.maximumf %74, %73 : vector<2x2xf32>
    %76 = vector.shape_cast %75 : vector<2x2xf32> to vector<2x2x1xf32>
    %77 = vector.broadcast %76 : vector<2x2x1xf32> to vector<2x2x3xf32>
    %78 = arith.subf %72, %77 : vector<2x2x3xf32>
    %79 = math.exp %78 : vector<2x2x3xf32>
    %cst_47 = arith.constant dense<0.000000e+00> : vector<2x2xf32>
    %80 = vector.multi_reduction <add>, %79, %cst_47 [2] : vector<2x2x3xf32> to vector<2x2xf32>
    %81 = vector.shape_cast %80 : vector<2x2xf32> to vector<2x2x1xf32>
    %82 = vector.broadcast %81 : vector<2x2x1xf32> to vector<2x2x3xf32>
    %83 = arith.divf %79, %82 : vector<2x2x3xf32>
    %84 = vector.extract_strided_slice %49 {offsets = [0, 0, 13], sizes = [2, 2, 1], strides = [1, 1, 1]} : vector<2x2x30xf32> to vector<2x2x1xf32>
    %cst_48 = arith.constant 0.000000e+00 : f32
    %85 = vector.broadcast %cst_48 : f32 to vector<2x2x1xf32>
    %86 = arith.maximumf %84, %85 : vector<2x2x1xf32>
    %87 = vector.broadcast %cst_48 : f32 to vector<2x2x1xf32>
    %88 = arith.subf %84, %87 : vector<2x2x1xf32>
    %89 = arith.cmpf one, %88, %88 : vector<2x2x1xf32>
    %90 = vector.broadcast %cst_48 : f32 to vector<2x2x1xf32>
    %91 = arith.addf %84, %90 : vector<2x2x1xf32>
    %92 = math.absf %88 : vector<2x2x1xf32>
    %cst_49 = arith.constant 0.000000e+00 : f32
    %93 = vector.broadcast %cst_49 : f32 to vector<2x2x1xf32>
    %94 = arith.subf %93, %92 : vector<2x2x1xf32>
    %95 = math.exp %94 : vector<2x2x1xf32>
    %96 = math.log1p %95 : vector<2x2x1xf32>
    %97 = arith.addf %86, %96 : vector<2x2x1xf32>
    %98 = arith.select %89, %91, %97 : vector<2x2x1xi1>, vector<2x2x1xf32>
    %cst_50 = arith.constant 1.000000e+00 : f32
    %99 = vector.broadcast %cst_50 : f32 to vector<2x2x1xf32>
    %100 = arith.addf %99, %98 : vector<2x2x1xf32>
    %101 = vector.extract_strided_slice %49 {offsets = [0, 0, 14], sizes = [2, 2, 8], strides = [1, 1, 1]} : vector<2x2x30xf32> to vector<2x2x8xf32>
    %102 = arith.negf %101 : vector<2x2x8xf32>
    %103 = math.exp %102 : vector<2x2x8xf32>
    %cst_51 = arith.constant 1.000000e+00 : f32
    %104 = vector.broadcast %cst_51 : f32 to vector<2x2x8xf32>
    %105 = arith.addf %104, %103 : vector<2x2x8xf32>
    %106 = arith.divf %104, %105 : vector<2x2x8xf32>
    %107 = vector.extract_strided_slice %49 {offsets = [0, 0, 22], sizes = [2, 2, 8], strides = [1, 1, 1]} : vector<2x2x30xf32> to vector<2x2x8xf32>
    %108 = arith.mulf %50, %50 : vector<2x2x8xf32>
    %cst_52 = arith.constant dense<0.000000e+00> : vector<2x2xf32>
    %109 = vector.multi_reduction <add>, %108, %cst_52 [2] : vector<2x2x8xf32> to vector<2x2xf32>
    %110 = vector.shape_cast %109 : vector<2x2xf32> to vector<2x2x1xf32>
    %111 = math.sqrt %110 : vector<2x2x1xf32>
    %112 = arith.mulf %15, %15 : vector<2x16x8xf32>
    %cst_53 = arith.constant dense<0.000000e+00> : vector<2x16xf32>
    %113 = vector.multi_reduction <add>, %112, %cst_53 [2] : vector<2x16x8xf32> to vector<2x16xf32>
    %114 = math.sqrt %113 : vector<2x16xf32>
    "tpu.trace_start"() <{level = 10 : i32, message = "bhm,bnm->bhn"}> : () -> ()
    %cst_54 = arith.constant dense<0.000000e+00> : vector<2x2x16xf32>
    %115 = tpu.matmul %50, %15, %cst_54 {dimension_numbers = #tpu.dot_dimension_numbers<[2], [2], [1], [1], [0, 0, 0, 1, 1, 1], [0], [0]>} : vector<2x2x8xf32>, vector<2x16x8xf32>, vector<2x2x16xf32> -> vector<2x2x16xf32>
    "tpu.trace_stop"() : () -> ()
    %116 = vector.shape_cast %114 : vector<2x16xf32> to vector<2x1x16xf32>
    %117 = vector.broadcast %111 : vector<2x2x1xf32> to vector<2x2x16xf32>
    %118 = vector.broadcast %116 : vector<2x1x16xf32> to vector<2x2x16xf32>
    %119 = arith.mulf %117, %118 : vector<2x2x16xf32>
    %cst_55 = arith.constant 9.99999993E-9 : f32
    %120 = vector.broadcast %cst_55 : f32 to vector<2x2x16xf32>
    %121 = arith.maximumf %119, %120 : vector<2x2x16xf32>
    %122 = arith.divf %115, %121 : vector<2x2x16xf32>
    %123 = vector.broadcast %65 : vector<2x2x1xf32> to vector<2x2x16xf32>
    %124 = arith.mulf %123, %122 : vector<2x2x16xf32>
    %cst_56 = arith.constant dense<0xFF800000> : vector<2x2xf32>
    %125 = vector.multi_reduction <maximumf>, %124, %cst_56 [2] : vector<2x2x16xf32> to vector<2x2xf32>
    %cst_57 = arith.constant 0xFF800000 : f32
    %126 = vector.broadcast %cst_57 : f32 to vector<2x2xf32>
    %127 = arith.maximumf %126, %125 : vector<2x2xf32>
    %128 = vector.shape_cast %127 : vector<2x2xf32> to vector<2x2x1xf32>
    %129 = vector.broadcast %128 : vector<2x2x1xf32> to vector<2x2x16xf32>
    %130 = arith.subf %124, %129 : vector<2x2x16xf32>
    %131 = math.exp %130 : vector<2x2x16xf32>
    %cst_58 = arith.constant dense<0.000000e+00> : vector<2x2xf32>
    %132 = vector.multi_reduction <add>, %131, %cst_58 [2] : vector<2x2x16xf32> to vector<2x2xf32>
    %133 = vector.shape_cast %132 : vector<2x2xf32> to vector<2x2x1xf32>
    %134 = vector.broadcast %133 : vector<2x2x1xf32> to vector<2x2x16xf32>
    %135 = arith.divf %131, %134 : vector<2x2x16xf32>
    %136 = vector.broadcast %71 : vector<2x2x1xf32> to vector<2x2x16xf32>
    %137 = arith.mulf %136, %135 : vector<2x2x16xf32>
    %cst_59 = arith.constant 1.000000e+00 : f32
    %138 = vector.broadcast %cst_59 : f32 to vector<2x2x1xf32>
    %139 = arith.subf %138, %71 : vector<2x2x1xf32>
    %c0_60 = arith.constant 0 : index
    %c0_61 = arith.constant 0 : index
    %c0_62 = arith.constant 0 : index
    %140 = vector.load %arg13[%c0_60, %c0_61, %c0_62] : memref<2x2x16xf32, #tpu.memory_space<vmem>>, vector<2x2x16xf32>
    %141 = vector.broadcast %139 : vector<2x2x1xf32> to vector<2x2x16xf32>
    %142 = arith.mulf %141, %140 : vector<2x2x16xf32>
    %143 = arith.addf %137, %142 : vector<2x2x16xf32>
    %144 = vector.extract_strided_slice %143 {offsets = [0, 0, 15], sizes = [2, 2, 1], strides = [1, 1, 1]} : vector<2x2x16xf32> to vector<2x2x1xf32>
    %145 = vector.extract_strided_slice %143 {offsets = [0, 0, 0], sizes = [2, 2, 15], strides = [1, 1, 1]} : vector<2x2x16xf32> to vector<2x2x15xf32>
    %146 = tpu.concatenate %144, %145 in 2 : vector<2x2x1xf32>, vector<2x2x15xf32> -> vector<2x2x16xf32>
    %147 = vector.extract_strided_slice %143 {offsets = [0, 0, 1], sizes = [2, 2, 15], strides = [1, 1, 1]} : vector<2x2x16xf32> to vector<2x2x15xf32>
    %148 = vector.extract_strided_slice %143 {offsets = [0, 0, 0], sizes = [2, 2, 1], strides = [1, 1, 1]} : vector<2x2x16xf32> to vector<2x2x1xf32>
    %149 = tpu.concatenate %147, %148 in 2 : vector<2x2x15xf32>, vector<2x2x1xf32> -> vector<2x2x16xf32>
    %150 = vector.extract_strided_slice %83 {offsets = [0, 0, 0], sizes = [2, 2, 1], strides = [1, 1, 1]} : vector<2x2x3xf32> to vector<2x2x1xf32>
    %151 = vector.broadcast %150 : vector<2x2x1xf32> to vector<2x2x16xf32>
    %152 = arith.mulf %151, %146 : vector<2x2x16xf32>
    %153 = vector.extract_strided_slice %83 {offsets = [0, 0, 1], sizes = [2, 2, 1], strides = [1, 1, 1]} : vector<2x2x3xf32> to vector<2x2x1xf32>
    %154 = vector.broadcast %153 : vector<2x2x1xf32> to vector<2x2x16xf32>
    %155 = arith.mulf %154, %143 : vector<2x2x16xf32>
    %156 = arith.addf %152, %155 : vector<2x2x16xf32>
    %157 = vector.extract_strided_slice %83 {offsets = [0, 0, 2], sizes = [2, 2, 1], strides = [1, 1, 1]} : vector<2x2x3xf32> to vector<2x2x1xf32>
    %158 = vector.broadcast %157 : vector<2x2x1xf32> to vector<2x2x16xf32>
    %159 = arith.mulf %158, %149 : vector<2x2x16xf32>
    %160 = arith.addf %156, %159 : vector<2x2x16xf32>
    %cst_63 = arith.constant 1.000000e-16 : f32
    %161 = vector.broadcast %cst_63 : f32 to vector<2x2x16xf32>
    %162 = arith.maximumf %160, %161 : vector<2x2x16xf32>
    %163 = math.log %162 : vector<2x2x16xf32>
    %164 = vector.broadcast %100 : vector<2x2x1xf32> to vector<2x2x16xf32>
    %165 = arith.mulf %164, %163 : vector<2x2x16xf32>
    %166 = math.exp %165 : vector<2x2x16xf32>
    %cst_64 = arith.constant dense<0.000000e+00> : vector<2x2xf32>
    %167 = vector.multi_reduction <add>, %166, %cst_64 [2] : vector<2x2x16xf32> to vector<2x2xf32>
    %168 = vector.shape_cast %167 : vector<2x2xf32> to vector<2x2x1xf32>
    %cst_65 = arith.constant 1.000000e-16 : f32
    %169 = vector.broadcast %cst_65 : f32 to vector<2x2x1xf32>
    %170 = arith.addf %168, %169 : vector<2x2x1xf32>
    %171 = vector.broadcast %170 : vector<2x2x1xf32> to vector<2x2x16xf32>
    %172 = arith.divf %166, %171 : vector<2x2x16xf32>
    %c0_66 = arith.constant 0 : index
    %c0_67 = arith.constant 0 : index
    %c0_68 = arith.constant 0 : index
    %173 = vector.load %arg13[%c0_66, %c0_67, %c0_68] : memref<2x2x16xf32, #tpu.memory_space<vmem>>, vector<2x2x16xf32>
    tpu.vector_store %arg13[%c0_66, %c0_67, %c0_68], %172 {strides = array<i32>} : memref<2x2x16xf32, #tpu.memory_space<vmem>>, vector<2x2x16xf32>,
    %174 = vector.extract_strided_slice %172 {offsets = [0, 0, 0], sizes = [2, 1, 16], strides = [1, 1, 1]} : vector<2x2x16xf32> to vector<2x1x16xf32>
    "tpu.trace_start"() <{level = 10 : i32, message = "bhn,bnm->bhm"}> : () -> ()
    %cst_69 = arith.constant dense<0.000000e+00> : vector<2x1x8xf32>
    %175 = tpu.matmul %174, %15, %cst_69 {dimension_numbers = #tpu.dot_dimension_numbers<[2], [1], [1], [2], [0, 0, 0, 1, 1, 2], [0], [0]>} : vector<2x1x16xf32>, vector<2x16x8xf32>, vector<2x1x8xf32> -> vector<2x1x8xf32>
    "tpu.trace_stop"() : () -> ()
    %176 = vector.shape_cast %175 : vector<2x1x8xf32> to vector<2x8xf32>
    %c0_70 = arith.constant 0 : index
    %c0_71 = arith.constant 0 : index
    %177 = vector.load %arg11[%c0_70, %c0_71] : memref<2x40xf32, #tpu.memory_space<vmem>>, vector<2x8xf32>
    tpu.vector_store %arg11[%c0_70, %c0_71], %176 {strides = array<i32>} : memref<2x40xf32, #tpu.memory_space<vmem>>, vector<2x8xf32>,
    %178 = vector.extract_strided_slice %172 {offsets = [0, 1, 0], sizes = [2, 1, 16], strides = [1, 1, 1]} : vector<2x2x16xf32> to vector<2x1x16xf32>
    %179 = vector.shape_cast %178 : vector<2x1x16xf32> to vector<2x16xf32>
    %180 = vector.extract_strided_slice %106 {offsets = [0, 1, 0], sizes = [2, 1, 8], strides = [1, 1, 1]} : vector<2x2x8xf32> to vector<2x1x8xf32>
    %181 = vector.shape_cast %180 : vector<2x1x8xf32> to vector<2x8xf32>
    %182 = vector.extract_strided_slice %107 {offsets = [0, 1, 0], sizes = [2, 1, 8], strides = [1, 1, 1]} : vector<2x2x8xf32> to vector<2x1x8xf32>
    %183 = vector.shape_cast %182 : vector<2x1x8xf32> to vector<2x8xf32>
    %184 = vector.shape_cast %179 : vector<2x16xf32> to vector<2x16x1xf32>
    %185 = vector.shape_cast %181 : vector<2x8xf32> to vector<2x1x8xf32>
    %186 = vector.broadcast %184 : vector<2x16x1xf32> to vector<2x16x8xf32>
    %187 = vector.broadcast %185 : vector<2x1x8xf32> to vector<2x16x8xf32>
    %188 = arith.mulf %186, %187 : vector<2x16x8xf32>
    %cst_72 = arith.constant 1.000000e+00 : f32
    %189 = vector.broadcast %cst_72 : f32 to vector<2x16x8xf32>
    %190 = arith.subf %189, %188 : vector<2x16x8xf32>
    %191 = arith.mulf %15, %190 : vector<2x16x8xf32>
    %192 = vector.shape_cast %183 : vector<2x8xf32> to vector<2x1x8xf32>
    %193 = vector.broadcast %184 : vector<2x16x1xf32> to vector<2x16x8xf32>
    %194 = vector.broadcast %192 : vector<2x1x8xf32> to vector<2x16x8xf32>
    %195 = arith.mulf %193, %194 : vector<2x16x8xf32>
    %196 = arith.addf %191, %195 : vector<2x16x8xf32>
    %c0_73 = arith.constant 0 : index
    %c0_74 = arith.constant 0 : index
    %c0_75 = arith.constant 0 : index
    %197 = vector.load %arg14[%c0_73, %c0_74, %c0_75] : memref<2x16x8xf32, #tpu.memory_space<vmem>>, vector<2x16x8xf32>
    tpu.vector_store %arg14[%c0_73, %c0_74, %c0_75], %196 {strides = array<i32>} : memref<2x16x8xf32, #tpu.memory_space<vmem>>, vector<2x16x8xf32>,
    %c0_76 = arith.constant 0 : index
    %c0_77 = arith.constant 0 : index
    %198 = vector.load %arg12[%c0_76, %c0_77] : memref<2x32xf32, #tpu.memory_space<vmem>>, vector<2x32xf32>
    tpu.vector_store %arg12[%c0_76, %c0_77], %43 {strides = array<i32>} : memref<2x32xf32, #tpu.memory_space<vmem>>, vector<2x32xf32>,
    %c0_78 = arith.constant 0 : index
    %c8 = arith.constant 8 : index
    %199 = vector.load %arg11[%c0_78, %c8] : memref<2x40xf32, #tpu.memory_space<vmem>>, vector<2x32xf32>
    tpu.vector_store %arg11[%c0_78, %c8], %45 {strides = array<i32>} : memref<2x40xf32, #tpu.memory_space<vmem>>, vector<2x32xf32>,
    %c0_79 = arith.constant 0 : index
    %c0_80 = arith.constant 0 : index
    %200 = vector.load %arg11[%c0_79, %c0_80] : memref<2x40xf32, #tpu.memory_space<vmem>>, vector<2x40xf32>
    %cst_81 = arith.constant dense<0.000000e+00> : vector<2x8xf32>
    %201 = tpu.matmul %200, %11, %cst_81 {dimension_numbers = #tpu.dot_dimension_numbers<[1], [0], [0], [1], [0, 0, 1, 1], [], []>} : vector<2x40xf32>, vector<40x8xf32>, vector<2x8xf32> -> vector<2x8xf32>
    %202 = vector.broadcast %12 : vector<1x8xf32> to vector<2x8xf32>
    %203 = arith.addf %201, %202 : vector<2x8xf32>
    %204 = arith.negf %203 : vector<2x8xf32>
    %205 = math.exp %204 : vector<2x8xf32>
    %cst_82 = arith.constant 1.000000e+00 : f32
    %206 = vector.broadcast %cst_82 : f32 to vector<2x8xf32>
    %207 = arith.addf %206, %205 : vector<2x8xf32>
    %208 = arith.divf %206, %207 : vector<2x8xf32>
    %209 = arith.index_cast %c0_i32 : i32 to index
    %c0_83 = arith.constant 0 : index
    %c0_84 = arith.constant 0 : index
    %210 = vector.load %arg10[%209, %c0_83, %c0_84] : memref<1x2x8xf32, #tpu.memory_space<vmem>>, vector<1x2x8xf32>
    %211 = vector.shape_cast %210 : vector<1x2x8xf32> to vector<2x8xf32>
    %212 = vector.shape_cast %208 : vector<2x8xf32> to vector<1x2x8xf32>
    tpu.vector_store %arg10[%209, %c0_83, %c0_84], %212 {strides = array<i32>} : memref<1x2x8xf32, #tpu.memory_space<vmem>>, vector<1x2x8xf32>,
    %c1_i32 = arith.constant 1 : i32
    return
  }
}

</mosaic_0001>

<bundles_post_ra>
// kernel: ntm_forward.1
= control target key start
LH: loop header
LB: loop body
LE: loop exit
PB: predicated region body
PF: predicated region fallthrough
CT: control target
= control target key end

     0   :  { %20 = vsyncpa [#allocation3], 0  ;;  %vm43_vm0 = vcmask 320512   ;;  %s1642_s0 = inlined_call_operand.vmem [shape: f32[1,2,128], index: 0, kind: input, shape index: {}]   ;;  %s1643_s1 = inlined_call_operand.vmem [shape: f32[2,40], index: 1, kind: input, shape index: {}]   ;;  %s1644_s2 = inlined_call_operand.vmem [shape: f32[2,32], index: 2, kind: input, shape index: {}]   ;;  %s1645_s3 = inlined_call_operand.vmem [shape: f32[2,2,16], index: 3, kind: input, shape index: {}]   ;;  %s1646_s4 = inlined_call_operand.vmem [shape: f32[2,16,8], index: 4, kind: input, shape index: {}]   ;;  %s1647_s5 = inlined_call_operand.vmem [shape: f32[40,128], index: 5, kind: input, shape index: {}]   ;;  %s1648_s6 = inlined_call_operand.vmem [shape: f32[32,60], index: 6, kind: input, shape index: {}]   ;;  %s1649_s7 = inlined_call_operand.vmem [shape: f32[1,60], index: 7, kind: input, shape index: {}]   ;;  %s1650_s8 = inlined_call_operand.vmem [shape: f32[40,8], index: 8, kind: input, shape index: {}]   ;;  %s1651_s9 = inlined_call_operand.vmem [shape: f32[1,8], index: 9, kind: input, shape index: {}]   ;;  %s1652_s10 = inlined_call_operand.hbm [shape: f32[1,2,8], index: 10, kind: output, shape index: {0}]   ;;  %s1653_s11 = inlined_call_operand.vmem [shape: f32[2,40], index: 11, kind: output, shape index: {1}]   ;;  %s1654_s12 = inlined_call_operand.hbm [shape: f32[2,32], index: 12, kind: output, shape index: {2}]   ;;  %s1655_s13 = inlined_call_operand.vmem [shape: f32[2,2,16], index: 13, kind: output, shape index: {3}]   ;;  %s1656_s14 = inlined_call_operand.vmem [shape: f32[2,16,8], index: 14, kind: output, shape index: {4}]  }
   0x1   :  { %v66_v0 = vld [vmem:[%s1647_s5 + $0x20] sm:$0xff]  ;;  %v65_v1 = vld [vmem:[%s1647_s5 + $0x18] sm:$0xff]  ;;  %v64_v3 = vld [vmem:[%s1647_s5 + $0x10] sm:$0xff] }
   0x2   :  { %100 = vmatpush.msra.mxu0 %v66_v0  ;;  %v42_v2 = vld [vmem:[%s1643_s1] sm:$0x3] }
   0x3   :  { %44 = vst.msk [vmem:[%s1653_s11] sm:$0x3] %vm43_vm0, %v42_v2 }
   0x4   :  { %101 = vmatpush.msra.mxu0 %v65_v1 }
   0x5   :  { %21 = vsyncpa [#allocation5], 0  ;;  %v63_v4 = vld [vmem:[%s1647_s5 + $0x8] sm:$0xff]  ;;  %v62_v5 = vld [vmem:[%s1647_s5] sm:$0xff]  ;;  %vm85_vm1 = vcmask 326656   ;;  %vm46_vm2 = vcmask 254976  }
   0x6   :  { %102 = vmatpush.msra.mxu0 %v64_v3  ;;  %v45_v7 = vld [vmem:[%s1644_s2] sm:$0x3]  ;;  %s1172_s5 = smov 64   ;;  %s1173_s16 = smov 32   ;;  %v70_v28 = vld [vmem:[%s1648_s6 + $0x18] sm:$0xff]  ;;  %v69_v29 = vld [vmem:[%s1648_s6 + $0x10] sm:$0xff] }
   0x7   :  { %47 = vst.msk [vmem:[#allocation4] sm:$0x3] %vm46_vm2, %v45_v7  ;;  %v84_v8 = vld [vmem:[%s1642_s0] sm:$0x3]  ;;  %172 = vmatpush.msra.mxu1 %v70_v28  ;;  %v68_v30 = vld [vmem:[%s1648_s6 + $0x8] sm:$0xff]  ;;  %s1174_s23 = smov 96  }
   0x8   :  { %103 = vmatpush.msra.mxu0 %v63_v4  ;;  %v67_v31 = vld [vmem:[%s1648_s6] sm:$0xff]  ;;  %vm157_vm7 = vcmask 261120   ;;  %v55_v37 = vld [vmem:[%s1646_s4 + $0x10] sm:$0xff]  ;;  %vm57_vm8 = vcmask 64512   ;;  %s1175_s28 = smov 98   ;;  %v56_v41 = vld [vmem:[%s1646_s4 + $0x18] sm:$0xff] }
   0x9   :  { %173 = vmatpush.msra.mxu1 %v69_v29  ;;  %60 = vst.msk [vmem:[%s1656_s14 + $0x10] sm:$0xff] %vm57_vm8, %v55_v37  ;;  %v1042_v38 = vld [vmem:[%s1649_s7] ss:$0 sm:$0xff]  ;;  %v54_v44 = vld [vmem:[%s1646_s4 + $0x8] sm:$0xff]  ;;  %v1176_v56 = vmov 8   ;;  %vm185_vm9 = vcmask 1047556  }
   0xa   :  { %104 = vmatpush.msra.mxu0 %v62_v5  ;;  %v78_v6 = vld [vmem:[%s1653_s11] sm:$0x3]  ;;  %61 = vst.msk [vmem:[%s1656_s14 + $0x18] sm:$0xff] %vm57_vm8, %v56_v41  ;;  %1027 = vset.pattern.permute.xlu0 %v1176_v56  ;;  %v1177_v57 = vmov 1934713408   ;;  %vm329_vm10 = vcmask 58368  }
   0xb   :  { %991 = vmatmul.msk.f32.vlgmr.msra.gmra.mxu0 %vm85_vm1, %v78_v6  ;;  %174 = vmatpush.msra.mxu1 %v68_v30  ;;  %v53_v42 = vld [vmem:[%s1646_s4] sm:$0xff]  ;;  %59 = vst.msk [vmem:[%s1656_s14 + $0x8] sm:$0xff] %vm57_vm8, %v54_v44  ;;  %v188_v58 = vunpack.c.l.s4 %v1177_v57  ;;  %v1178_v2 = vmov 9   ;;  %vm267_vm11 = vcmask 99408   ;;  %s1179_s27 = smov 118   ;;  %s1184_s18 = smov 127  }
   0xc   :  { %58 = vst.msk [vmem:[%s1656_s14] sm:$0xff] %vm57_vm8, %v53_v42  ;;  %1028 = vset.pattern.permute.xlu1 %v1176_v56  ;;  %1030 = vset.pattern.permute.xlu2 %v1178_v2  ;;  %s1185_s19 = smov 113   ;;  %s1186_s22 = smov 1  }
   0xd   :  { %175 = vmatpush.msra.mxu1 %v67_v31  ;;  %v189_v59 = vunpack.c.0.s8 %v188_v58  ;;  %s1189_s2 = smov 106   ;;  %s1190_s17 = smov 114  }
   0xe   :  { %v79_v12 = vld [vmem:[#allocation4] sm:$0x3]  ;;  %s1191_s21 = smov [#allocation4]   ;;  %s967_s24 = sshll.u32 %s1654_s12, 4  ;;  %s968_s24 = int_to_ptr.hbm [resolvable:$true] %s967_s24 }
  0x10   :  { %v82_v47 = vld [vmem:[%s1656_s14 + $0x10] sm:$0xff] }
  0x11   :  { %v83_v43 = vld [vmem:[%s1656_s14 + $0x18] sm:$0xff]  ;;  %v362_v50 = vmul.f32 %v82_v47, %v82_v47 }
  0x12   :  { %v363_v45 = vmul.f32 %v83_v43, %v83_v43  ;;  %999 = vmatpush.xpose.msk.msra.mxu3 %vm57_vm8, %v83_v43  ;;  %v81_v48 = vld [vmem:[%s1656_s14 + $0x8] sm:$0xff] }
  0x13   :  { %996 = vmatpush.xpose.msk.msra.mxu2 %vm57_vm8, %v81_v48  ;;  %771 = vmatpush.msrb.mxu1 %v81_v48  ;;  %v80_v49 = vld [vmem:[%s1656_s14] sm:$0xff]  ;;  %v370_v51 = vsel %vm57_vm8, %v362_v50, 0.0  ;;  %v361_v54 = vmul.f32 %v81_v48, %v81_v48 }
  0x14   :  { %v373_v46 = vsel %vm57_vm8, %v363_v45, 0.0  ;;  %v360_v52 = vmul.f32 %v80_v49, %v80_v49 }
  0x15   :  { %772 = vmatpush.msrb.mxu1 %v80_v49  ;;  %v367_v55 = vsel %vm57_vm8, %v361_v54, 0.0 }
  0x16   :  { %1000 = vmatpush.xpose.msk.msra.mxu3 %vm57_vm8, %v82_v47  ;;  %v364_v53 = vsel %vm57_vm8, %v360_v52, 0.0 }
  0x17   :  { %997 = vmatpush.xpose.msk.msra.mxu2 %vm57_vm8, %v80_v49 }
  0x1b   :  { %794 = vmatpush.msrb.mxu2 %v83_v43 }
  0x1d   :  { %795 = vmatpush.msrb.mxu2 %v82_v47 }
  0x88   :  { %v106_v9 = vpop.f32.mrf.mxu0 }
  0x89   :  { %v109_v10 = vadd.f32 %v106_v9, %v84_v8 }
  0x8b   :  { %1044 = vtanh.f32 %v109_v10  ;;  %v992_v13 = vmul.f32 -1.442695, %v109_v10 }
  0x8d   :  { %1046 = vpow2.f32 %v992_v13 }
  0x91   :  { %v1045_v11 = vpop.eup %1044 }
  0x92   :  { %136 = vrot.lane.b32.xlu0 %v1045_v11, %s1172_s5 }
  0x93   :  { %v1047_v14 = vpop.eup %1046 }
  0x94   :  { %v113_v15 = vadd.f32 1.0, %v1047_v14 }
  0x96   :  { %1048 = vrcp.f32 %v113_v15  ;;  %v125_v21 = vand.u32 2147483648, %v113_v15  ;;  %vm119_vm4 = vweird.f32 %v113_v15  ;;  %v123_v22 = vand.u32 2147483647, %v113_v15 }
  0x98   :  { %v126_v24 = vor.u32 1.1754944e-38, %v125_v21  ;;  %vm124_vm6 = vcmp.eq.f32.partialorder %v123_v22, 8.507059e+37 }
  0x9a   :  { %131 = vrot.lane.b32.xlu0 %v79_v12, %s1173_s16 }
  0x9c   :  { %v1049_v16 = vpop.eup %1048 }
  0x9d   :  { %v115_v17 = vmul.f32 %v1049_v16, %v113_v15  ;;  %vm120_vm3 = vweird.f32 %v1049_v16 }
  0x9e   :  { %vm121_vm5 = vmor %vm119_vm4, %vm120_vm3 }
  0x9f   :  { %v116_v18 = vsub.f32 1.0, %v115_v17 }
  0xa1   :  { %v117_v19 = vmul.f32 %v1049_v16, %v116_v18 }
  0xa3   :  { %v118_v20 = vadd.f32 %v1049_v16, %v117_v19 }
  0xa5   :  { %v122_v23 = vsel %vm121_vm5, %v1049_v16, %v118_v20 }
  0xa6   :  { %v1301_v26 = vsel %vm124_vm6, %v126_v24, %v122_v23 }
  0xc4   :  { %374 = vadd.xlane.f32.xlu0 %v373_v46 }
 0x104   :  { %v137_v25 = vpop.permute.xlu0 %136 }
 0x105   :  { %v139_v27 = vmul.f32 %v137_v25, %v1301_v26 }
 0x107   :  { %141 = vrot.lane.b32.xlu1 %v139_v27, %s1173_s16 }
 0x10c   :  { %v132_v32 = vpop.permute.xlu0 %131 }
 0x10d   :  { %v134_v33 = vmul.f32 %v132_v32, %v1301_v26 }
 0x137   :  { %v1420_v57 = vpop.xlane.xlu0 %374 }
 0x138   :  { %vm419_vm5 = vcmp.eq.f32.partialorder %v1420_v57, inf  ;;  %vm421_vm6 = vcmp.eq.f32.partialorder %v1420_v57, 0.0 }
 0x179   :  { %v142_v34 = vpop.permute.xlu1 %141 }
 0x17a   :  { %v1317_v35 = vadd.f32 %v142_v34, %v134_v33 }
 0x17c   :  { %155 = vrot.lane.b32.xlu1 %v1317_v35, %s1174_s23  ;;  %s1187_s23 = smov 15  }
 0x1ee   :  { %v156_v36 = vpop.permute.xlu1 %155 }
 0x1ef   :  { %893 = vst.msk [vmem:[#allocation4] sm:$0x3] %vm46_vm2, %v156_v36  ;;  %993 = vmatmul.msk.f32.vlgmr.msra.gmra.mxu1 %vm157_vm7, %v156_v36 }
 0x26c   :  { %v177_v39 = vpop.f32.mrf.mxu1 }
 0x26d   :  { %v178_v40 = vadd.f32 %v1042_v38, %v177_v39 }
 0x26f   :  { %181 = vrot.lane.b32.xlu2 %v178_v40, %s1175_s28 }
 0x298   :  { %371 = vadd.xlane.f32.xlu2 %v370_v51 }
 0x2a0   :  { %365 = vadd.xlane.f32.xlu2 %v364_v53 }
 0x2a8   :  { %368 = vadd.xlane.f32.xlu2 %v367_v55 }
 0x2c9   :  { %v182_v60 = vpop.permute.xlu2 %181 }
 0x2ca   :  { %v184_v61 = vrot.slane %v182_v60, 4 }
 0x2cc   :  { %v186_v62 = vsel %vm185_vm9, %v184_v61, %v178_v40 }
 0x2cd   :  { %v1372_v63 = vperm.slane %v186_v62, %v189_v59 }
 0x2cf   :  { %v191_v0 = vrot.slane %v1372_v63, 4  ;;  %998 = vmatmul.msk.f32.vlgmr.msra.gmra.mxu2 %vm57_vm8, %v1372_v63  ;;  %v327_v1 = vmul.f32 %v1372_v63, %v1372_v63  ;;  %v199_v3 = vand.u32 2147483647, %v1372_v63  ;;  %v268_v15 = vsel %vm267_vm11, %v1372_v63, -inf }
 0x2d0   :  { %v193_v36 = vmax.f32 %v1372_v63, 0.0  ;;  %vm195_vm14 = vcmp.ne.f32.partialorder %v1372_v63, %v1372_v63 }
 0x2d1   :  { %v1381_v4 = vsel %vm185_vm9, 0.0, %v191_v0  ;;  %v330_v5 = vsel %vm329_vm10, %v327_v1, 0.0  ;;  %v201_v9 = vsub.f32 0.0, %v199_v3 }
 0x2d2   :  { %v200_v6 = vand.u32 2147483647, %v1381_v4  ;;  %331 = vadd.xlane.f32.xlu0 %v330_v5  ;;  %1001 = vmatmul.msk.f32.vlgmr.msra.gmra.mxu3 %vm57_vm8, %v1381_v4  ;;  %v271_v7 = vsel %vm267_vm11, %v1381_v4, -inf  ;;  %v328_v8 = vmul.f32 %v1381_v4, %v1381_v4  ;;  %v995_v10 = vmul.f32 -1.442695, %v1381_v4 }
 0x2d3   :  { %272 = vmax.xlane.f32.xlu2 %v271_v7  ;;  %v203_v13 = vmul.f32 1.442695, %v201_v9  ;;  %v194_v42 = vmax.f32 %v1381_v4, 0.0  ;;  %vm196_vm15 = vcmp.ne.f32.partialorder %v1381_v4, %v1381_v4 }
 0x2d4   :  { %v202_v11 = vsub.f32 0.0, %v200_v6  ;;  %v333_v12 = vsel %vm329_vm10, %v328_v8, 0.0  ;;  %1050 = vpow2.f32 %v995_v10 }
 0x2d5   :  { %334 = vadd.xlane.f32.xlu1 %v333_v12  ;;  %1052 = vpow2.f32 %v203_v13 }
 0x2d6   :  { %v205_v14 = vmul.f32 1.442695, %v202_v11 }
 0x2d8   :  { %1054 = vpow2.f32 %v205_v14 }
 0x2da   :  { %v1051_v16 = vpop.eup %1050 }
 0x2db   :  { %269 = vmax.xlane.f32.xlu2 %v268_v15  ;;  %v1053_v17 = vpop.eup %1052  ;;  %v236_v18 = vadd.f32 1.0, %v1051_v16 }
 0x2dc   :  { %v207_v19 = vadd.f32 1.0, %v1053_v17  ;;  %v210_v21 = vmul.f32 -0.5, %v1053_v17  ;;  %v213_v25 = vand.u32 2147483647, %v1053_v17 }
 0x2dd   :  { %1056 = vrcp.f32 %v236_v18  ;;  %v263_v49 = vand.u32 2147483648, %v236_v18  ;;  %vm257_vm2 = vweird.f32 %v236_v18  ;;  %v261_v50 = vand.u32 2147483647, %v236_v18 }
 0x2de   :  { %v1055_v20 = vpop.eup %1054  ;;  %1058 = vlog2.f32 %v207_v19  ;;  %v211_v24 = vadd.f32 1.0, %v210_v21  ;;  %vm214_vm12 = vcmp.lt.f32.partialorder %v213_v25, 0.0004427343  ;;  %v486_v19 = vlaneseq }
 0x2df   :  { %v216_v22 = vadd.f32 1.0, %v1055_v20  ;;  %v219_v23 = vmul.f32 -0.5, %v1055_v20  ;;  %v222_v30 = vand.u32 2147483647, %v1055_v20  ;;  %v264_v52 = vor.u32 1.1754944e-38, %v263_v49 }
 0x2e0   :  { %v212_v33 = vmul.f32 %v1053_v17, %v211_v24  ;;  %vm262_vm4 = vcmp.eq.f32.partialorder %v261_v50, 8.507059e+37 }
 0x2e1   :  { %1060 = vlog2.f32 %v216_v22  ;;  %v220_v28 = vadd.f32 1.0, %v219_v23  ;;  %vm223_vm13 = vcmp.lt.f32.partialorder %v222_v30, 0.0004427343 }
 0x2e3   :  { %v1057_v27 = vpop.eup %1056  ;;  %v221_v40 = vmul.f32 %v1055_v20, %v220_v28  ;;  %v1438_v28 = vand.u32 127, %v486_v19 }
 0x2e4   :  { %v1059_v29 = vpop.eup %1058  ;;  %v253_v31 = vmul.f32 %v1057_v27, %v236_v18  ;;  %vm258_vm0 = vweird.f32 %v1057_v27 }
 0x2e5   :  { %v209_v32 = vmul.f32 0.6931472, %v1059_v29  ;;  %vm259_vm3 = vmor %vm257_vm2, %vm258_vm0  ;;  %vm491_vm2 = vcmask 130112  }
 0x2e6   :  { %v254_v37 = vsub.f32 1.0, %v253_v31 }
 0x2e7   :  { %v1061_v34 = vpop.eup %1060  ;;  %v215_v38 = vsel %vm214_vm12, %v212_v33, %v209_v32 }
 0x2e8   :  { %v218_v39 = vmul.f32 0.6931472, %v1061_v34  ;;  %v225_v41 = vadd.f32 %v215_v38, %v193_v36  ;;  %v255_v46 = vmul.f32 %v1057_v27, %v254_v37 }
 0x2ea   :  { %v224_v43 = vsel %vm223_vm13, %v221_v40, %v218_v39  ;;  %v1400_v44 = vsel %vm195_vm14, %v1372_v63, %v225_v41  ;;  %v256_v48 = vadd.f32 %v1057_v27, %v255_v46  ;;  %v422_v46 = vand.u32 2147483648, %v1420_v57 }
 0x2eb   :  { %v226_v45 = vadd.f32 %v224_v43, %v194_v42  ;;  %535 = vperm.xlu0 %1027, %v1400_v44  }
 0x2ec   :  { %v260_v51 = vsel %vm259_vm3, %v1057_v27, %v256_v48 }
 0x2ed   :  { %v1406_v47 = vsel %vm196_vm15, %v1381_v4, %v226_v45  ;;  %v1411_v53 = vsel %vm262_vm4, %v264_v52, %v260_v51 }
 0x2ee   :  { %540 = vperm.xlu1 %1028, %v1406_v47  }
 0x2f3   :  { %1031 = vset.pattern.permute.xlu0 %v1178_v2 }
 0x2f6   :  { %1029 = vset.pattern.permute.xlu1 %v1178_v2 }
 0x2f7   :  { %600 = vperm.xlu1 %1029, %v1411_v53  }
 0x30b   :  { %v1414_v54 = vpop.xlane.xlu2 %371 }
 0x30c   :  { %vm407_vm11 = vcmp.eq.f32.partialorder %v1414_v54, inf  ;;  %vm409_vm14 = vcmp.eq.f32.partialorder %v1414_v54, 0.0  ;;  %v410_v51 = vand.u32 2147483648, %v1414_v54 }
 0x313   :  { %v1416_v55 = vpop.xlane.xlu2 %365 }
 0x314   :  { %1062 = vrsqrt.f32 %v1416_v55  ;;  %vm383_vm7 = vcmp.eq.f32.partialorder %v1416_v55, inf  ;;  %vm385_vm12 = vcmp.eq.f32.partialorder %v1416_v55, 0.0  ;;  %v386_v37 = vand.u32 2147483648, %v1416_v55 }
 0x31a   :  { %v1063_v58 = vpop.eup %1062 }
 0x31b   :  { %v1418_v56 = vpop.xlane.xlu2 %368  ;;  %v377_v62 = vmul.f32 %v1063_v58, %v1416_v55 }
 0x31c   :  { %1064 = vrsqrt.f32 %v1418_v56  ;;  %vm395_vm9 = vcmp.eq.f32.partialorder %v1418_v56, inf  ;;  %v398_v38 = vand.u32 2147483648, %v1418_v56  ;;  %vm397_vm13 = vcmp.eq.f32.partialorder %v1418_v56, 0.0 }
 0x31d   :  { %1066 = vrsqrt.f32 %v1420_v57  ;;  %v378_v3 = vmul.f32 %v1063_v58, %v377_v62 }
 0x31e   :  { %1068 = vrsqrt.f32 %v1414_v54 }
 0x31f   :  { %v379_v8 = vmul.f32 0.5, %v378_v3 }
 0x321   :  { %v380_v12 = vsub.f32 1.5, %v379_v8 }
 0x322   :  { %v1065_v59 = vpop.eup %1064 }
 0x323   :  { %v1067_v60 = vpop.eup %1066  ;;  %v389_v0 = vmul.f32 %v1065_v59, %v1418_v56  ;;  %v381_v20 = vmul.f32 %v1063_v58, %v380_v12 }
 0x324   :  { %v1069_v61 = vpop.eup %1068  ;;  %v413_v2 = vmul.f32 %v1067_v60, %v1420_v57 }
 0x325   :  { %v401_v1 = vmul.f32 %v1069_v61, %v1414_v54  ;;  %v390_v5 = vmul.f32 %v1065_v59, %v389_v0  ;;  %v382_v29 = vmul.f32 %v381_v20, %v1416_v55 }
 0x326   :  { %v414_v7 = vmul.f32 %v1067_v60, %v413_v2 }
 0x327   :  { %v402_v6 = vmul.f32 %v1069_v61, %v401_v1  ;;  %v391_v9 = vmul.f32 0.5, %v390_v5  ;;  %v384_v41 = vsel %vm383_vm7, %v1416_v55, %v382_v29 }
 0x328   :  { %v415_v11 = vmul.f32 0.5, %v414_v7  ;;  %v387_v58 = vsel %vm385_vm12, %v386_v37, %v384_v41 }
 0x329   :  { %v403_v10 = vmul.f32 0.5, %v402_v6  ;;  %v392_v13 = vsub.f32 1.5, %v391_v9  ;;  %v488_v3 = vperm.slane %v387_v58, %v1438_v28 }
 0x32a   :  { %v416_v16 = vsub.f32 1.5, %v415_v11 }
 0x32b   :  { %v404_v15 = vsub.f32 1.5, %v403_v10  ;;  %v393_v21 = vmul.f32 %v1065_v59, %v392_v13 }
 0x32c   :  { %v417_v25 = vmul.f32 %v1067_v60, %v416_v16 }
 0x32d   :  { %v405_v24 = vmul.f32 %v1069_v61, %v404_v15  ;;  %v394_v30 = vmul.f32 %v393_v21, %v1418_v56  ;;  %v489_v61 = vadd.s32 4294967288, %v1438_v28 }
 0x32e   :  { %v418_v33 = vmul.f32 %v417_v25, %v1420_v57 }
 0x32f   :  { %v406_v32 = vmul.f32 %v405_v24, %v1414_v54  ;;  %v396_v42 = vsel %vm395_vm9, %v1418_v56, %v394_v30 }
 0x330   :  { %v420_v52 = vsel %vm419_vm5, %v1420_v57, %v418_v33  ;;  %v399_v59 = vsel %vm397_vm13, %v398_v38, %v396_v42 }
 0x331   :  { %v408_v50 = vsel %vm407_vm11, %v1414_v54, %v406_v32  ;;  %v423_v0 = vsel %vm421_vm6, %v422_v46, %v420_v52  ;;  %v490_v5 = vperm.slane %v399_v59, %v489_v61 }
 0x332   :  { %v411_v2 = vsel %vm409_vm14, %v410_v51, %v408_v50  ;;  %v494_v7 = vperm.slane %v423_v0, %v489_v61  ;;  %v994_v0 = vmul.f32 -1.442695, %v1372_v63 }
 0x333   :  { %v493_v57 = vperm.slane %v411_v2, %v1438_v28  ;;  %v492_v13 = vsel %vm491_vm2, %v490_v5, %v488_v3 }
 0x335   :  { %v495_v21 = vsel %vm491_vm2, %v494_v7, %v493_v57 }
 0x345   :  { %v1430_v14 = vpop.xlane.xlu0 %331 }
 0x346   :  { %1070 = vrsqrt.f32 %v1430_v14  ;;  %v273_v17 = vpop.xlane.xlu2 %272  ;;  %vm343_vm15 = vcmp.eq.f32.partialorder %v1430_v14, inf  ;;  %v346_v8 = vand.u32 2147483648, %v1430_v14  ;;  %vm345_vm0 = vcmp.eq.f32.partialorder %v1430_v14, 0.0 }
 0x347   :  { %v275_v18 = vsub.f32 %v1381_v4, %v273_v17 }
 0x348   :  { %v1434_v22 = vpop.xlane.xlu1 %334 }
 0x349   :  { %v278_v23 = vmul.f32 1.442695, %v275_v18  ;;  %1072 = vrsqrt.f32 %v1434_v22  ;;  %vm355_vm3 = vcmp.eq.f32.partialorder %v1434_v22, inf  ;;  %v358_v15 = vand.u32 2147483648, %v1434_v22 }
 0x34a   :  { %vm357_vm4 = vcmp.eq.f32.partialorder %v1434_v22, 0.0 }
 0x34b   :  { %1074 = vpow2.f32 %v278_v23 }
 0x34c   :  { %v1071_v27 = vpop.eup %1070 }
 0x34d   :  { %v337_v31 = vmul.f32 %v1071_v27, %v1430_v14 }
 0x34e   :  { %v270_v34 = vpop.xlane.xlu2 %269 }
 0x34f   :  { %v1073_v36 = vpop.eup %1072  ;;  %v338_v39 = vmul.f32 %v1071_v27, %v337_v31  ;;  %v274_v40 = vsub.f32 %v1372_v63, %v270_v34 }
 0x350   :  { %v349_v43 = vmul.f32 %v1073_v36, %v1434_v22 }
 0x351   :  { %v1458_v45 = vpop.eup %1074  ;;  %v339_v48 = vmul.f32 0.5, %v338_v39  ;;  %v276_v49 = vmul.f32 1.442695, %v274_v40 }
 0x352   :  { %v350_v56 = vmul.f32 %v1073_v36, %v349_v43  ;;  %284 = vrot.lane.b32.xlu2 %v1458_v45, %s1179_s27  ;;  %v450_v40 = vpop.f32.mrf.mxu2 }
 0x353   :  { %v340_v60 = vsub.f32 1.5, %v339_v48  ;;  %1076 = vpow2.f32 %v276_v49 }
 0x354   :  { %v351_v62 = vmul.f32 0.5, %v350_v56 }
 0x355   :  { %v341_v1 = vmul.f32 %v1071_v27, %v340_v60  ;;  %v479_v50 = vpop.f32.mrf.mxu3 }
 0x356   :  { %v352_v6 = vsub.f32 1.5, %v351_v62  ;;  %v606_v62 = vsub.f32 1.0, %v1411_v53 }
 0x357   :  { %v342_v55 = vmul.f32 %v341_v1, %v1430_v14 }
 0x358   :  { %v353_v9 = vmul.f32 %v1073_v36, %v352_v6 }
 0x359   :  { %v1481_v10 = vpop.eup %1076  ;;  %v344_v11 = vsel %vm343_vm15, %v1430_v14, %v342_v55  ;;  %vm50_vm15 = vcmask 123904  }
 0x35a   :  { %v347_v54 = vsel %vm345_vm0, %v346_v8, %v344_v11  ;;  %v354_v12 = vmul.f32 %v353_v9, %v1434_v22  ;;  %282 = vrot.lane.b32.xlu0 %v1481_v10, %s1179_s27  ;;  %vm288_vm0 = vcmask 17408  }
 0x35b   :  { %v499_v16 = vmul.f32 %v492_v13, %v347_v54 }
 0x35c   :  { %v356_v17 = vsel %vm355_vm3, %v1434_v22, %v354_v12 }
 0x35d   :  { %v359_v18 = vsel %vm357_vm4, %v358_v15, %v356_v17  ;;  %v501_v20 = vmax.f32 %v499_v16, 1e-08  ;;  %v536_v49 = vpop.permute.xlu0 %535  ;;  %v49_v17 = vld [vmem:[%s1645_s3 + $0x2] sm:$0x3] }
 0x35e   :  { %v500_v14 = vmul.f32 %v495_v21, %v359_v18  ;;  %52 = vst.msk [vmem:[%s1655_s13 + $0x2] sm:$0x3] %vm50_vm15, %v49_v17 }
 0x35f   :  { %1078 = vrcp.f32 %v501_v20  ;;  %v514_v29 = vand.u32 2147483648, %v501_v20  ;;  %v512_v32 = vand.u32 2147483647, %v501_v20  ;;  %vm508_vm6 = vweird.f32 %v501_v20 }
 0x360   :  { %v502_v23 = vmax.f32 %v500_v14, 1e-08  ;;  %v541_v59 = vpop.permute.xlu1 %540 }
 0x361   :  { %v515_v36 = vor.u32 1.1754944e-38, %v514_v29  ;;  %vm513_vm11 = vcmp.eq.f32.partialorder %v512_v32, 8.507059e+37  ;;  %v1181_v32 = vmov 12  }
 0x362   :  { %1080 = vrcp.f32 %v502_v23  ;;  %v529_v22 = vand.u32 2147483648, %v502_v23  ;;  %v527_v38 = vand.u32 2147483647, %v502_v23  ;;  %vm523_vm12 = vweird.f32 %v502_v23 }
 0x363   :  { %1082 = vpow2.f32 %v994_v0 }
 0x364   :  { %v530_v46 = vor.u32 1.1754944e-38, %v529_v22  ;;  %vm528_vm14 = vcmp.eq.f32.partialorder %v527_v38, 8.507059e+37 }
 0x365   :  { %v1079_v24 = vpop.eup %1078 }
 0x366   :  { %v504_v25 = vmul.f32 %v1079_v24, %v501_v20  ;;  %vm509_vm5 = vweird.f32 %v1079_v24 }
 0x367   :  { %vm510_vm7 = vmor %vm508_vm6, %vm509_vm5 }
 0x368   :  { %v1081_v27 = vpop.eup %1080  ;;  %v505_v28 = vsub.f32 1.0, %v504_v25 }
 0x369   :  { %v519_v30 = vmul.f32 %v1081_v27, %v502_v23  ;;  %vm524_vm9 = vweird.f32 %v1081_v27  ;;  %v1083_v1 = vpop.eup %1082  ;;  %v1509_v23 = vpop.permute.xlu1 %600 }
 0x36a   :  { %v506_v31 = vmul.f32 %v1079_v24, %v505_v28  ;;  %vm525_vm13 = vmor %vm523_vm12, %vm524_vm9  ;;  %v235_v2 = vadd.f32 1.0, %v1083_v1 }
 0x36b   :  { %v520_v33 = vsub.f32 1.0, %v519_v30 }
 0x36c   :  { %v507_v34 = vadd.f32 %v1079_v24, %v506_v31  ;;  %1084 = vrcp.f32 %v235_v2  ;;  %v248_v57 = vand.u32 2147483648, %v235_v2  ;;  %vm242_vm3 = vweird.f32 %v235_v2 }
 0x36d   :  { %v521_v37 = vmul.f32 %v1081_v27, %v520_v33  ;;  %v246_v11 = vand.u32 2147483647, %v235_v2  ;;  %v1180_v31 = vmov 11  }
 0x36e   :  { %v511_v39 = vsel %vm510_vm7, %v1079_v24, %v507_v34  ;;  %v249_v12 = vor.u32 1.1754944e-38, %v248_v57 }
 0x36f   :  { %v516_v41 = vsel %vm513_vm11, %v515_v36, %v511_v39  ;;  %v522_v42 = vadd.f32 %v1081_v27, %v521_v37  ;;  %vm247_vm5 = vcmp.eq.f32.partialorder %v246_v11, 8.507059e+37 }
 0x370   :  { %v517_v43 = vmul.f32 %v516_v41, %v450_v40  ;;  %v1182_v41 = vmov 10  }
 0x371   :  { %v526_v48 = vsel %vm525_vm13, %v1081_v27, %v522_v42 }
 0x372   :  { %v531_v51 = vsel %vm528_vm14, %v530_v46, %v526_v48  ;;  %v543_v52 = vmul.f32 %v536_v49, %v517_v43  ;;  %v1085_v3 = vpop.eup %1084 }
 0x373   :  { %v532_v56 = vmul.f32 %v531_v51, %v479_v50  ;;  %v238_v55 = vmul.f32 %v1085_v3, %v235_v2  ;;  %vm243_vm2 = vweird.f32 %v1085_v3  ;;  %v48_v50 = vld [vmem:[%s1645_s3] sm:$0x3]  ;;  %s1192_s3 = smov [#allocation2]  }
 0x374   :  { %v545_v58 = vsel %vm50_vm15, %v543_v52, -inf  ;;  %vm244_vm4 = vmor %vm242_vm3, %vm243_vm2  ;;  %51 = vst.msk [vmem:[%s1655_s13] sm:$0x3] %vm50_vm15, %v48_v50 }
 0x375   :  { %546 = vmax.xlane.f32.xlu1 %v545_v58  ;;  %v544_v60 = vmul.f32 %v541_v59, %v532_v56  ;;  %v239_v7 = vsub.f32 1.0, %v238_v55  ;;  %v1183_v55 = vmov 13  }
 0x377   :  { %v548_v61 = vsel %vm50_vm15, %v544_v60, -inf  ;;  %v240_v8 = vmul.f32 %v1085_v3, %v239_v7 }
 0x379   :  { %v241_v9 = vadd.f32 %v1085_v3, %v240_v8 }
 0x37b   :  { %549 = vmax.xlane.f32.xlu2 %v548_v61  ;;  %v245_v54 = vsel %vm244_vm4, %v1085_v3, %v241_v9 }
 0x37c   :  { %v1497_v13 = vsel %vm247_vm5, %v249_v12, %v245_v54 }
 0x37d   :  { %v605_v18 = vsub.f32 1.0, %v1497_v13 }
 0x393   :  { %616 = vperm.xlu2 %1030, %v606_v62  }
 0x39b   :  { %1033 = vset.pattern.permute.xlu2 %v1180_v31  ;;  %v607_v31 = vld [vmem:[%s1655_s13] sm:$0x3] }
 0x3ac   :  { %v285_v5 = vpop.permute.xlu2 %284 }
 0x3ad   :  { %v292_v6 = vsel %vm288_vm0, %v285_v5, 0.0 }
 0x3ae   :  { %293 = vadd.xlane.f32.xlu0 %v292_v6 }
 0x3c2   :  { %595 = vperm.xlu0 %1031, %v1497_v13  }
 0x3ca   :  { %1034 = vset.pattern.permute.xlu0 %v1181_v32 }
 0x3cc   :  { %v283_v15 = vpop.permute.xlu0 %282 }
 0x3cd   :  { %v289_v16 = vsel %vm288_vm0, %v283_v15, 0.0 }
 0x3ce   :  { %290 = vadd.xlane.f32.xlu1 %v289_v16 }
 0x3e7   :  { %611 = vperm.xlu1 %1029, %v605_v18  }
 0x3e8   :  { %v547_v27 = vpop.xlane.xlu1 %546 }
 0x3e9   :  { %v551_v28 = vsub.f32 %v543_v52, %v547_v27 }
 0x3eb   :  { %v553_v29 = vmul.f32 1.442695, %v551_v28 }
 0x3ee   :  { %v550_v20 = vpop.xlane.xlu2 %549 }
 0x3ef   :  { %v552_v21 = vsub.f32 %v544_v60, %v550_v20  ;;  %1032 = vset.pattern.permute.xlu1 %v1182_v41 }
 0x3f1   :  { %v555_v14 = vmul.f32 1.442695, %v552_v21 }
 0x3f3   :  { %1086 = vpow2.f32 %v555_v14 }
 0x3f4   :  { %1088 = vpow2.f32 %v553_v29 }
 0x3f6   :  { %v617_v3 = vpop.permute.xlu2 %616 }
 0x3f9   :  { %v1511_v24 = vpop.eup %1086 }
 0x3fa   :  { %v560_v25 = vsel %vm50_vm15, %v1511_v24, 0.0  ;;  %v1515_v30 = vpop.eup %1088 }
 0x3fb   :  { %561 = vadd.xlane.f32.xlu2 %v560_v25  ;;  %v557_v33 = vsel %vm50_vm15, %v1515_v30, 0.0 }
 0x411   :  { %558 = vadd.xlane.f32.xlu1 %v557_v33 }
 0x421   :  { %v294_v34 = vpop.xlane.xlu0 %293 }
 0x422   :  { %1090 = vrcp.f32 %v294_v34  ;;  %v321_v38 = vand.u32 2147483648, %v294_v34  ;;  %v319_v40 = vand.u32 2147483647, %v294_v34  ;;  %vm315_vm7 = vweird.f32 %v294_v34 }
 0x424   :  { %v322_v43 = vor.u32 1.1754944e-38, %v321_v38  ;;  %vm320_vm11 = vcmp.eq.f32.partialorder %v319_v40, 8.507059e+37 }
 0x428   :  { %v1091_v22 = vpop.eup %1090 }
 0x429   :  { %v311_v36 = vmul.f32 %v1091_v22, %v294_v34  ;;  %vm316_vm6 = vweird.f32 %v1091_v22 }
 0x42a   :  { %vm317_vm9 = vmor %vm315_vm7, %vm316_vm6 }
 0x42b   :  { %v312_v37 = vsub.f32 1.0, %v311_v36 }
 0x42d   :  { %v313_v39 = vmul.f32 %v1091_v22, %v312_v37 }
 0x42f   :  { %v314_v42 = vadd.f32 %v1091_v22, %v313_v39 }
 0x431   :  { %v318_v46 = vsel %vm317_vm9, %v1091_v22, %v314_v42  ;;  %v608_v42 = vld [vmem:[%s1655_s13 + $0x2] sm:$0x3] }
 0x432   :  { %v323_v48 = vsel %vm320_vm11, %v322_v43, %v318_v46  ;;  %v326_v46 = vadd.f32 1.0, %v1406_v47 }
 0x433   :  { %v324_v49 = vmul.f32 %v1458_v45, %v323_v48 }
 0x434   :  { %v596_v36 = vpop.permute.xlu0 %595 }
 0x435   :  { %684 = vperm.xlu0 %1034, %v324_v49   ;;  %672 = vperm.xlu2 %1033, %v324_v49  }
 0x43d   :  { %1036 = vset.pattern.permute.xlu0 %v1183_v55 }
 0x441   :  { %v291_v51 = vpop.xlane.xlu1 %290 }
 0x442   :  { %1092 = vrcp.f32 %v291_v51  ;;  %v306_v59 = vand.u32 2147483648, %v291_v51  ;;  %v304_v45 = vand.u32 2147483647, %v291_v51  ;;  %vm300_vm13 = vweird.f32 %v291_v51 }
 0x444   :  { %v307_v62 = vor.u32 1.1754944e-38, %v306_v59  ;;  %vm305_vm0 = vcmp.eq.f32.partialorder %v304_v45, 8.507059e+37 }
 0x448   :  { %v1093_v52 = vpop.eup %1092 }
 0x449   :  { %v296_v56 = vmul.f32 %v1093_v52, %v291_v51  ;;  %vm301_vm12 = vweird.f32 %v1093_v52 }
 0x44a   :  { %vm302_vm14 = vmor %vm300_vm13, %vm301_vm12  ;;  %vm637_vm12 = vcmask 7168   ;;  %vm652_vm13 = vcmask 121856  }
 0x44b   :  { %v297_v58 = vsub.f32 1.0, %v296_v56 }
 0x44d   :  { %v298_v60 = vmul.f32 %v1093_v52, %v297_v58 }
 0x44f   :  { %v299_v61 = vadd.f32 %v1093_v52, %v298_v60 }
 0x451   :  { %v303_v0 = vsel %vm302_vm14, %v1093_v52, %v299_v61 }
 0x452   :  { %v308_v1 = vsel %vm305_vm0, %v307_v62, %v303_v0 }
 0x453   :  { %v1529_v2 = vmul.f32 %v1481_v10, %v308_v1 }
 0x455   :  { %657 = vperm.xlu1 %1032, %v1529_v2  }
 0x459   :  { %v612_v6 = vpop.permute.xlu1 %611 }
 0x45a   :  { %v619_v38 = vmul.f32 %v612_v6, %v607_v31 }
 0x45d   :  { %662 = vperm.xlu1 %1032, %v324_v49  }
 0x465   :  { %1037 = vset.pattern.permute.xlu1 %v1183_v55 }
 0x46e   :  { %v562_v5 = vpop.xlane.xlu2 %561 }
 0x46f   :  { %1094 = vrcp.f32 %v562_v5  ;;  %vm583_vm4 = vweird.f32 %v562_v5  ;;  %v589_v20 = vand.u32 2147483648, %v562_v5  ;;  %v587_v14 = vand.u32 2147483647, %v562_v5 }
 0x471   :  { %v590_v33 = vor.u32 1.1754944e-38, %v589_v20  ;;  %vm588_vm11 = vcmp.eq.f32.partialorder %v587_v14, 8.507059e+37 }
 0x475   :  { %v1095_v7 = vpop.eup %1094 }
 0x476   :  { %v579_v8 = vmul.f32 %v1095_v7, %v562_v5  ;;  %vm584_vm2 = vweird.f32 %v1095_v7 }
 0x477   :  { %vm1532_vm5 = vmor %vm583_vm4, %vm584_vm2  ;;  %vm753_vm4 = vcmask 130048  }
 0x478   :  { %v580_v57 = vsub.f32 1.0, %v579_v8 }
 0x47a   :  { %v581_v54 = vmul.f32 %v1095_v7, %v580_v57 }
 0x47c   :  { %v582_v16 = vadd.f32 %v1095_v7, %v581_v54 }
 0x47e   :  { %v586_v28 = vsel %vm1532_vm5, %v1095_v7, %v582_v16 }
 0x47f   :  { %v591_v37 = vsel %vm588_vm11, %v590_v33, %v586_v28  ;;  %vm898_vm11 = vcmask 320576  }
 0x480   :  { %v592_v40 = vmul.f32 %v1511_v24, %v591_v37 }
 0x482   :  { %v604_v43 = vmul.f32 %v1509_v23, %v592_v40  ;;  %v325_v23 = vadd.f32 1.0, %v1400_v44 }
 0x484   :  { %v559_v9 = vpop.xlane.xlu1 %558 }
 0x485   :  { %1096 = vrcp.f32 %v559_v9  ;;  %v574_v15 = vand.u32 2147483648, %v559_v9  ;;  %v572_v18 = vand.u32 2147483647, %v559_v9  ;;  %vm568_vm6 = vweird.f32 %v559_v9 }
 0x486   :  { %1098 = vtanh.f32 %v1317_v35 }
 0x487   :  { %v575_v27 = vor.u32 1.1754944e-38, %v574_v15  ;;  %vm573_vm9 = vcmp.eq.f32.partialorder %v572_v18, 8.507059e+37 }
 0x48b   :  { %v1097_v11 = vpop.eup %1096 }
 0x48c   :  { %v564_v12 = vmul.f32 %v1097_v11, %v559_v9  ;;  %vm569_vm3 = vweird.f32 %v1097_v11  ;;  %v1099_v24 = vpop.eup %1098 }
 0x48d   :  { %vm570_vm7 = vmor %vm568_vm6, %vm569_vm3 }
 0x48e   :  { %v565_v10 = vsub.f32 1.0, %v564_v12 }
 0x48f   :  { %v673_v47 = vpop.permute.xlu2 %672 }
 0x490   :  { %v566_v17 = vmul.f32 %v1097_v11, %v565_v10 }
 0x492   :  { %v567_v25 = vadd.f32 %v1097_v11, %v566_v17 }
 0x494   :  { %v571_v29 = vsel %vm570_vm7, %v1097_v11, %v567_v25 }
 0x495   :  { %v576_v34 = vsel %vm573_vm9, %v575_v27, %v571_v29 }
 0x496   :  { %v577_v22 = vmul.f32 %v1515_v30, %v576_v34  ;;  %v620_v30 = vmul.f32 %v617_v3, %v608_v42 }
 0x498   :  { %v603_v39 = vmul.f32 %v596_v36, %v577_v22  ;;  %v622_v48 = vadd.f32 %v620_v30, %v604_v43  ;;  %v808_v36 = vshrl.u32 %v486_v19, 7 }
 0x49a   :  { %v621_v41 = vadd.f32 %v619_v38, %v603_v39  ;;  %v676_v0 = vmul.f32 %v673_v47, %v622_v48  ;;  %v815_v37 = vadd.s32 8, %v808_v36 }
 0x49c   :  { %640 = vrot.lane.b32.xlu0 %v621_v41, %s1184_s18  ;;  %625 = vrot.lane.b32.xlu1 %v621_v41, %s1185_s19 }
 0x49d   :  { %631 = vrot.lane.b32.xlu2 %v621_v41, %s1186_s22 }
 0x4a4   :  { %704 = vperm.xlu0 %1036, %v326_v46   ;;  %627 = vrot.lane.b32.xlu1 %v622_v48, %s1185_s19 }
 0x4a5   :  { %633 = vrot.lane.b32.xlu2 %v622_v48, %s1186_s22  ;;  %s965_s22 = sshll.u32 %s1191_s21, 4  ;;  %s966_s22 = int_to_ptr.vmem [resolvable:$true] %s965_s22 }
 0x4a6   :  { %970 = dma.vmem_to_hbm [thread:$0]  %s966_s22, 32, %s968_s24, [#allocation5]  }
 0x4a7   :  { %v685_v50 = vpop.permute.xlu0 %684 }
 0x4ac   :  { %642 = vrot.lane.b32.xlu1 %v622_v48, %s1184_s18  ;;  %147 = vrot.lane.b32.xlu0 %v1099_v24, %s1172_s5  ;;  %s1188_s5 = smov 40  }
 0x4ad   :  { %648 = vrot.lane.b32.xlu2 %v622_v48, %s1187_s23  ;;  %1038 = vset.pattern.permute.xlu0 %v808_v36 }
 0x4b4   :  { %646 = vrot.lane.b32.xlu1 %v621_v41, %s1187_s23 }
 0x4b5   :  { %668 = vperm.xlu2 %1033, %v1529_v2  }
 0x4bc   :  { %699 = vperm.xlu1 %1037, %v325_v23  }
 0x4bd   :  { %1035 = vset.pattern.permute.xlu2 %v1181_v32 }
 0x4be   :  { %680 = vperm.xlu2 %1035, %v1529_v2  }
 0x4c4   :  { %1040 = vset.pattern.permute.xlu1 %v815_v37 }
 0x4c6   :  { %1039 = vset.pattern.permute.xlu2 %v815_v37 }
 0x4c7   :  { %v658_v49 = vpop.permute.xlu1 %657 }
 0x4cf   :  { %v663_v51 = vpop.permute.xlu1 %662 }
 0x4f7   :  { %v632_v35 = vpop.permute.xlu2 %631 }
 0x4ff   :  { %v634_v52 = vpop.permute.xlu2 %633 }
 0x507   :  { %v649_v59 = vpop.permute.xlu2 %648 }
 0x50e   :  { %v626_v56 = vpop.permute.xlu1 %625  ;;  %v641_v58 = vpop.permute.xlu0 %640 }
 0x50f   :  { %v669_v44 = vpop.permute.xlu2 %668  ;;  %v638_v55 = vsel %vm637_vm12, %v626_v56, %v632_v35 }
 0x510   :  { %v665_v8 = vmul.f32 %v658_v49, %v638_v55  ;;  %v675_v9 = vmul.f32 %v669_v44, %v621_v41 }
 0x512   :  { %v677_v10 = vadd.f32 %v675_v9, %v665_v8  ;;  %v862_v8 = vperm.slane %v1372_v63, 1 }
 0x516   :  { %v705_v60 = vpop.permute.xlu0 %704  ;;  %v628_v45 = vpop.permute.xlu1 %627 }
 0x517   :  { %v639_v61 = vsel %vm637_vm12, %v628_v45, %v634_v52 }
 0x518   :  { %v666_v62 = vmul.f32 %v663_v51, %v639_v61  ;;  %v681_v54 = vpop.permute.xlu2 %680 }
 0x51a   :  { %v678_v5 = vadd.f32 %v676_v0, %v666_v62 }
 0x51e   :  { %v643_v32 = vpop.permute.xlu1 %642  ;;  %v148_v1 = vpop.permute.xlu0 %147 }
 0x51f   :  { %v654_v2 = vsel %vm652_vm13, %v643_v32, %v649_v59  ;;  %v150_v3 = vmul.f32 %v148_v1, %v1301_v26  ;;  %v76_v1 = vld [vmem:[%s1650_s8 + $0x20] sm:$0xff] }
 0x520   :  { %v688_v6 = vmul.f32 %v685_v50, %v654_v2  ;;  %v75_v2 = vld [vmem:[%s1650_s8 + $0x18] sm:$0xff]  ;;  %918 = vmatpush.msrb.mxu3 %v76_v1 }
 0x521   :  { %895 = vrot.lane.b32.xlu0 %v150_v3, %s1188_s5  ;;  %v74_v3 = vld [vmem:[%s1650_s8 + $0x10] sm:$0xff] }
 0x522   :  { %v690_v7 = vadd.f32 %v688_v6, %v678_v5  ;;  %919 = vmatpush.msrb.mxu3 %v75_v2  ;;  %v73_v5 = vld [vmem:[%s1650_s8 + $0x8] sm:$0xff]  ;;  %v72_v6 = vld [vmem:[%s1650_s8] sm:$0xff] }
 0x524   :  { %v692_v57 = vmax.f32 %v690_v7, 1e-16  ;;  %920 = vmatpush.msrb.mxu3 %v74_v3  ;;  %v832_v7 = vperm.slane %v1497_v13, 1 }
 0x526   :  { %1100 = vlog2.f32 %v692_v57  ;;  %v647_v11 = vpop.permute.xlu1 %646  ;;  %921 = vmatpush.msrb.mxu3 %v73_v5 }
 0x527   :  { %v653_v12 = vsel %vm652_vm13, %v641_v58, %v647_v11 }
 0x528   :  { %v687_v15 = vmul.f32 %v681_v54, %v653_v12  ;;  %922 = vmatpush.msrb.mxu3 %v72_v6 }
 0x52a   :  { %v689_v16 = vadd.f32 %v687_v15, %v677_v10 }
 0x52c   :  { %v1101_v17 = vpop.eup %1100  ;;  %v691_v18 = vmax.f32 %v689_v16, 1e-16  ;;  %v833_v16 = vperm.slane %v1411_v53, 1 }
 0x52d   :  { %v696_v26 = vmul.f32 0.6931472, %v1101_v17  ;;  %v863_v17 = vperm.slane %v1381_v4, 1 }
 0x52e   :  { %1102 = vlog2.f32 %v691_v18  ;;  %v700_v27 = vpop.permute.xlu1 %699 }
 0x52f   :  { %v708_v20 = vmul.f32 %v705_v60, %v696_v26 }
 0x531   :  { %v711_v21 = vmul.f32 1.442695, %v708_v20 }
 0x533   :  { %1104 = vpow2.f32 %v711_v21 }
 0x534   :  { %v1103_v14 = vpop.eup %1102 }
 0x535   :  { %v694_v25 = vmul.f32 0.6931472, %v1103_v14 }
 0x537   :  { %v707_v28 = vmul.f32 %v700_v27, %v694_v25 }
 0x539   :  { %v1105_v29 = vpop.eup %1104  ;;  %v709_v31 = vmul.f32 1.442695, %v707_v28 }
 0x53a   :  { %v716_v33 = vsel %vm50_vm15, %v1105_v29, 0.0 }
 0x53b   :  { %1106 = vpow2.f32 %v709_v31  ;;  %717 = vadd.xlane.f32.xlu2 %v716_v33 }
 0x541   :  { %v1107_v34 = vpop.eup %1106 }
 0x542   :  { %v713_v22 = vsel %vm50_vm15, %v1107_v34, 0.0 }
 0x543   :  { %714 = vadd.xlane.f32.xlu1 %v713_v22  ;;  %v1116_v22 = vld [vmem:[%s1656_s14] sm:$0xff] }
 0x593   :  { %v896_v55 = vpop.permute.xlu0 %895 }
 0x5ae   :  { %v718_v38 = vpop.xlane.xlu2 %717 }
 0x5af   :  { %v720_v39 = vadd.f32 1e-16, %v718_v38 }
 0x5b1   :  { %1108 = vrcp.f32 %v720_v39  ;;  %v747_v46 = vand.u32 2147483648, %v720_v39  ;;  %v745_v24 = vand.u32 2147483647, %v720_v39  ;;  %vm741_vm0 = vweird.f32 %v720_v39 }
 0x5b3   :  { %v748_v47 = vor.u32 1.1754944e-38, %v747_v46  ;;  %vm746_vm3 = vcmp.eq.f32.partialorder %v745_v24, 8.507059e+37  ;;  %v1118_v46 = vld [vmem:[%s1656_s14 + $0x18] sm:$0xff] }
 0x5b6   :  { %v715_v40 = vpop.xlane.xlu1 %714 }
 0x5b7   :  { %v1109_v41 = vpop.eup %1108  ;;  %v719_v42 = vadd.f32 1e-16, %v715_v40  ;;  %v1117_v40 = vld [vmem:[%s1656_s14 + $0x8] sm:$0xff] }
 0x5b8   :  { %v737_v43 = vmul.f32 %v1109_v41, %v720_v39  ;;  %vm742_vm14 = vweird.f32 %v1109_v41 }
 0x5b9   :  { %1110 = vrcp.f32 %v719_v42  ;;  %vm743_vm2 = vmor %vm741_vm0, %vm742_vm14  ;;  %v732_v56 = vand.u32 2147483648, %v719_v42  ;;  %v730_v60 = vand.u32 2147483647, %v719_v42  ;;  %vm726_vm6 = vweird.f32 %v719_v42 }
 0x5ba   :  { %v738_v30 = vsub.f32 1.0, %v737_v43 }
 0x5bb   :  { %v733_v61 = vor.u32 1.1754944e-38, %v732_v56  ;;  %vm731_vm9 = vcmp.eq.f32.partialorder %v730_v60, 8.507059e+37 }
 0x5bc   :  { %v739_v48 = vmul.f32 %v1109_v41, %v738_v30 }
 0x5be   :  { %v740_v23 = vadd.f32 %v1109_v41, %v739_v48 }
 0x5bf   :  { %v1111_v19 = vpop.eup %1110 }
 0x5c0   :  { %v722_v49 = vmul.f32 %v1111_v19, %v719_v42  ;;  %v744_v35 = vsel %vm743_vm2, %v1109_v41, %v740_v23  ;;  %vm727_vm5 = vweird.f32 %v1111_v19 }
 0x5c1   :  { %v749_v50 = vsel %vm746_vm3, %v748_v47, %v744_v35  ;;  %vm728_vm7 = vmor %vm726_vm6, %vm727_vm5 }
 0x5c2   :  { %v723_v51 = vsub.f32 1.0, %v722_v49  ;;  %v750_v52 = vmul.f32 %v1105_v29, %v749_v50  ;;  %v1043_v50 = vld [vmem:[%s1651_s9] ss:$0 sm:$0xff]  ;;  %s954_s9 = sshll.u32 %s1652_s10, 4  ;;  %s955_s9 = int_to_ptr.hbm [resolvable:$true] %s954_s9 }
 0x5c4   :  { %v724_v58 = vmul.f32 %v1111_v19, %v723_v51  ;;  %752 = vst.msk [vmem:[%s1655_s13 + $0x2] sm:$0x3] %vm50_vm15, %v750_v52  ;;  %1003 = vmatmul.msk.f32.vlgmr.msrb.gmra.mxu2 %vm753_vm4, %v750_v52  ;;  %v819_v59 = vperm.slane %v750_v52, 1 }
 0x5c6   :  { %830 = vperm.xlu1 %1040, %v819_v59   ;;  %v725_v45 = vadd.f32 %v1111_v19, %v724_v58 }
 0x5c8   :  { %v729_v62 = vsel %vm728_vm7, %v1111_v19, %v725_v45  ;;  %v1119_v19 = vld [vmem:[%s1656_s14 + $0x10] sm:$0xff] }
 0x5c9   :  { %v734_v44 = vsel %vm731_vm9, %v733_v61, %v729_v62 }
 0x5ca   :  { %v735_v0 = vmul.f32 %v1107_v34, %v734_v44 }
 0x5cc   :  { %751 = vst.msk [vmem:[%s1655_s13] sm:$0x3] %vm50_vm15, %v735_v0  ;;  %1002 = vmatmul.msk.f32.vlgmr.msrb.gmra.mxu1 %vm753_vm4, %v735_v0  ;;  %v806_v32 = vperm.slane %v735_v0, 1  ;;  %vm496_vm15 = vcmask 1041409  }
 0x5ce   :  { %817 = vperm.xlu2 %1039, %v806_v32   ;;  %811 = vperm.xlu0 %1038, %v806_v32  }
 0x5d6   :  { %824 = vperm.xlu0 %1038, %v819_v59  }
 0x5de   :  { %1041 = vset.pattern.permute.xlu0 %v815_v37 }
 0x628   :  { %v818_v12 = vpop.permute.xlu2 %817 }
 0x629   :  { %v835_v15 = vmul.f32 %v832_v7, %v818_v12  ;;  %v865_v53 = vmul.f32 %v862_v8, %v818_v12 }
 0x62b   :  { %v839_v25 = vsub.f32 1.0, %v835_v15 }
 0x638   :  { %v831_v10 = vpop.permute.xlu1 %830 }
 0x639   :  { %v867_v26 = vmul.f32 %v863_v17, %v831_v10  ;;  %v837_v4 = vmul.f32 %v833_v16, %v831_v10 }
 0x63b   :  { %v841_v28 = vsub.f32 1.0, %v837_v4 }
 0x640   :  { %v812_v9 = vpop.permute.xlu0 %811 }
 0x641   :  { %v834_v57 = vmul.f32 %v832_v7, %v812_v9  ;;  %v864_v11 = vmul.f32 %v862_v8, %v812_v9 }
 0x643   :  { %v838_v54 = vsub.f32 1.0, %v834_v57  ;;  %872 = vrot.lane.b32.xlu1 %v864_v11, %s1189_s2 }
 0x645   :  { %846 = vrot.lane.b32.xlu0 %v838_v54, %s1190_s17 }
 0x647   :  { %v797_v18 = vpop.f32.mrf.mxu2 }
 0x648   :  { %v802_v13 = vrot.slane %v797_v18, 7  ;;  %v825_v63 = vpop.permute.xlu0 %824 }
 0x649   :  { %v836_v20 = vmul.f32 %v833_v16, %v825_v63  ;;  %v774_v21 = vpop.f32.mrf.mxu1  ;;  %v866_v31 = vmul.f32 %v863_v17, %v825_v63 }
 0x64a   :  { %v803_v14 = vsel %vm496_vm15, %v802_v13, %v774_v21 }
 0x64b   :  { %v840_v27 = vsub.f32 1.0, %v836_v20  ;;  %805 = vst.msk [vmem:[%s1653_s11] sm:$0x3] %vm329_vm10, %v803_v14  ;;  %878 = vrot.lane.b32.xlu1 %v867_v26, %s1189_s2 }
 0x64c   :  { %899 = vst.msk [vmem:[%s1653_s11] sm:$0x3] %vm898_vm11, %v896_v55 }
 0x64d   :  { %848 = vrot.lane.b32.xlu0 %v839_v25, %s1190_s17  ;;  %850 = vrot.lane.b32.xlu2 %v840_v27, %s1190_s17 }
 0x653   :  { %v900_v29 = vld [vmem:[%s1653_s11] sm:$0x3] }
 0x654   :  { %1004 = vmatmul.msk.f32.vlgmr.msrb.gmra.mxu3 %vm85_vm1, %v900_v29 }
 0x655   :  { %852 = vrot.lane.b32.xlu0 %v841_v28, %s1190_s17  ;;  %874 = vrot.lane.b32.xlu2 %v865_v53, %s1189_s2 }
 0x65d   :  { %876 = vrot.lane.b32.xlu0 %v866_v31, %s1189_s2 }
 0x6a7   :  { %v851_v33 = vpop.permute.xlu2 %850 }
 0x6a8   :  { %v860_v47 = vmul.f32 %v1119_v19, %v851_v33 }
 0x6af   :  { %v875_v42 = vpop.permute.xlu2 %874 }
 0x6b5   :  { %v873_v37 = vpop.permute.xlu1 %872 }
 0x6b7   :  { %v847_v34 = vpop.permute.xlu0 %846 }
 0x6b8   :  { %v858_v36 = vmul.f32 %v1116_v22, %v847_v34 }
 0x6ba   :  { %v884_v38 = vadd.f32 %v873_v37, %v858_v36 }
 0x6bc   :  { %888 = vst.msk [vmem:[%s1656_s14] sm:$0xff] %vm57_vm8, %v884_v38 }
 0x6bd   :  { %v879_v24 = vpop.permute.xlu1 %878 }
 0x6bf   :  { %v849_v39 = vpop.permute.xlu0 %848 }
 0x6c0   :  { %v859_v41 = vmul.f32 %v1117_v40, %v849_v39 }
 0x6c2   :  { %v885_v43 = vadd.f32 %v875_v42, %v859_v41 }
 0x6c4   :  { %889 = vst.msk [vmem:[%s1656_s14 + $0x8] sm:$0xff] %vm57_vm8, %v885_v43 }
 0x6c7   :  { %v853_v30 = vpop.permute.xlu0 %852 }
 0x6c8   :  { %v861_v48 = vmul.f32 %v1118_v46, %v853_v30 }
 0x6ca   :  { %v887_v23 = vadd.f32 %v879_v24, %v861_v48 }
 0x6cc   :  { %891 = vst.msk [vmem:[%s1656_s14 + $0x18] sm:$0xff] %vm57_vm8, %v887_v23 }
 0x6cf   :  { %v877_v49 = vpop.permute.xlu0 %876 }
 0x6d0   :  { %v886_v35 = vadd.f32 %v877_v49, %v860_v47 }
 0x6d2   :  { %890 = vst.msk [vmem:[%s1656_s14 + $0x10] sm:$0xff] %vm57_vm8, %v886_v35  ;;  %s952_s14 = sshll.u32 %s1192_s3, 4  ;;  %s953_s14 = int_to_ptr.vmem [resolvable:$true] %s952_s14 }
 0x6d7   :  { %v924_v51 = vpop.f32.mrf.mxu3 }
 0x6d8   :  { %v925_v52 = vadd.f32 %v1043_v50, %v924_v51 }
 0x6da   :  { %v1005_v56 = vmul.f32 -1.442695, %v925_v52 }
 0x6dc   :  { %1112 = vpow2.f32 %v1005_v56 }
 0x6e2   :  { %v1113_v58 = vpop.eup %1112 }
 0x6e3   :  { %v930_v59 = vadd.f32 1.0, %v1113_v58 }
 0x6e5   :  { %1114 = vrcp.f32 %v930_v59  ;;  %v942_v62 = vand.u32 2147483648, %v930_v59  ;;  %v940_v0 = vand.u32 2147483647, %v930_v59  ;;  %vm936_vm8 = vweird.f32 %v930_v59 }
 0x6e7   :  { %v943_v1 = vor.u32 1.1754944e-38, %v942_v62  ;;  %vm941_vm13 = vcmp.eq.f32.partialorder %v940_v0, 8.507059e+37 }
 0x6eb   :  { %v1115_v60 = vpop.eup %1114 }
 0x6ec   :  { %v932_v45 = vmul.f32 %v1115_v60, %v930_v59  ;;  %vm937_vm1 = vweird.f32 %v1115_v60 }
 0x6ed   :  { %vm938_vm12 = vmor %vm936_vm8, %vm937_vm1 }
 0x6ee   :  { %v933_v61 = vsub.f32 1.0, %v932_v45 }
 0x6f0   :  { %v934_v44 = vmul.f32 %v1115_v60, %v933_v61 }
 0x6f2   :  { %v935_v32 = vadd.f32 %v1115_v60, %v934_v44 }
 0x6f4   :  { %v939_v2 = vsel %vm938_vm12, %v1115_v60, %v935_v32 }
 0x6f5   :  { %v944_v3 = vsel %vm941_vm13, %v943_v1, %v939_v2 }
 0x6f6   :  { %946 = vst.msk [vmem:[#allocation2] sm:$0x3] %vm329_vm10, %v944_v3 }
 0x6f7   :  { %957 = dma.vmem_to_hbm [thread:$0]  %s953_s14, 32, %s955_s9, [#allocation3]  }
 0x6f8   :  { %1168 = dma.done.wait [#allocation3], 32  }
 0x6f9   :  { %1169 = vsyncadd [#allocation3], 4294967264 }
 0x6fa   :  { %1170 = dma.done.wait [#allocation5], 32  }
 0x6fb   :  { %1171 = vsyncadd [#allocation5], 4294967264 }
 0x6fc   :  { %989 = vsyncpa [#allocation3], 1 }
 0x6fd   :  { %990 = vsyncpa [#allocation5], 1 }

</bundles_post_ra>
